<compile_context>
chip_gen: v5e
topology: v5e:2x2
jax: 0.10.0
libtpu: 0.0.40
codegen_flags: <defaults>
</compile_context>

<pallas_src>
import functools

import jax
import jax.numpy as jnp
from jax.experimental import pallas as pl
from jax.experimental.pallas import tpu as pltpu

# ----------------------------- model config ---------------------------------
DIM = 32          # stands in for 768 (bert hidden size) at small test scale
HEADS = 8         # module default
HEAD_DIM = DIM // HEADS
BATCH = 2         # number of text pairs
SEQ = 256         # token sequence length (multiple of S_TILE)
S_TILE = 128      # sequence rows streamed per grid step (>=128, multiple of 16)
VOCAB = 100
OUT_PAD = 128     # lane-dense padded width of the fused fc output


# ------------------------------ Pallas kernel --------------------------------
def text_match_kernel(h1_ref, h2_ref,
                      wq_ref, bq_ref,
                      wkv_ref, bkv_ref,
                      wofc_ref, bofc_ref,
                      out_ref,
                      sum1_ref, sum2_ref,
                      *, heads, seq_len):
    """Streamed mean-pool (MXU) + head-batched cross attention + fused classifier."""
    s = pl.program_id(0)
    n_s = pl.num_programs(0)

    # --- init f32 accumulators on the first sequence tile ----------------------
    @pl.when(s == 0)
    def _():
        sum1_ref[...] = jnp.zeros_like(sum1_ref)
        sum2_ref[...] = jnp.zeros_like(sum2_ref)

    # --- accumulate partial sequence sums on the MXU ---------------------------
    # Batched (B,1,S_TILE) x (B,S_TILE,D) contraction: keeps the (otherwise idle)
    # MXU busy and frees the VPU/XLU sublane-reduction slots at large S_TILE.
    B = sum1_ref.shape[0]
    ones_row = jnp.ones((B, 1, h1_ref.shape[1]), h1_ref.dtype)
    sum1_ref[...] += jnp.einsum('bos,bsd->bod', ones_row, h1_ref[...],
                                preferred_element_type=jnp.float32)[:, 0, :]
    sum2_ref[...] += jnp.einsum('bos,bsd->bod', ones_row, h2_ref[...],
                                preferred_element_type=jnp.float32)[:, 0, :]

    # --- on the last tile: attention + fused classifier (one-time epilogue) ----
    @pl.when(s == n_s - 1)
    def _():
        B, D = sum1_ref.shape
        dh = D // heads
        inv_s = 1.0 / jnp.float32(seq_len)
        x1 = sum1_ref[...] * inv_s          # (B, D)  query side  (torch mean(dim=1))
        x2 = sum2_ref[...] * inv_s          # (B, D)  key/value side

        # Q projection (softmax scale 1/sqrt(dh) already folded into wq/bq).
        q = jnp.dot(x1, wq_ref[...], preferred_element_type=jnp.float32) + bq_ref[...]
        # Fused K|V projection: single (B, D) @ (D, 2D) matmul.
        kv = jnp.dot(x2, wkv_ref[...], preferred_element_type=jnp.float32) + bkv_ref[...]
        k = kv[:, :D]
        v = kv[:, D:]

        # Head-batched attention (heads on a leading batch axis).  At real scale
        # keep D a multiple of 128 so these reshapes/swaps don't relayout.
        qh = q.reshape(B, heads, dh).swapaxes(0, 1)     # (heads, B, dh)
        kh = k.reshape(B, heads, dh).swapaxes(0, 1)     # (heads, B, dh)
        vh = v.reshape(B, heads, dh).swapaxes(0, 1)     # (heads, B, dh)

        scores = jnp.einsum('hbd,hcd->hbc', qh, kh,
                            preferred_element_type=jnp.float32)   # (heads, B, B)
        attn = jax.nn.softmax(scores, axis=-1)
        ctx = jnp.einsum('hbc,hcd->hbd', attn, vh,
                         preferred_element_type=jnp.float32)      # (heads, B, dh)
        ctx = ctx.swapaxes(0, 1).reshape(B, D)                    # (B, D)

        # Output projection and classifier fc fused into one lane-dense matmul:
        # wofc = wo @ wfc padded to (D, 128); column 0 holds the real logit.
        out_ref[...] = (jnp.dot(ctx, wofc_ref[...],
                                preferred_element_type=jnp.float32)
                        + bofc_ref[...])                           # (B, 128)


# ------------------------------ wrapper --------------------------------------
def prepare_fused_params(params, heads):
    """One-time wrapper-side algebraic fusions of the torch-style weights."""
    D = params["wq"].shape[0]
    dh = D // heads
    scale = 1.0 / jnp.sqrt(jnp.float32(dh))

    wq_s = params["wq"] * scale                                   # fold softmax scale
    bq_s = params["bq"] * scale
    wkv = jnp.concatenate([params["wk"], params["wv"]], axis=1)   # (D, 2D)
    bkv = jnp.concatenate([params["bk"], params["bv"]], axis=1)   # (1, 2D)

    # Fold fc into the attention output projection; pad to 128 lanes so the
    # output store is an unmasked, lane-dense block.
    wofc = params["wo"] @ params["wfc"]                           # (D, 1)
    bofc = params["bo"] @ params["wfc"] + params["bfc"]           # (1, 1)
    wofc_pad = jnp.zeros((D, OUT_PAD), jnp.float32).at[:, :1].set(wofc)
    bofc_pad = jnp.zeros((1, OUT_PAD), jnp.float32).at[:, :1].set(bofc)

    return {"wq": wq_s, "bq": bq_s, "wkv": wkv, "bkv": bkv,
            "wofc": wofc_pad, "bofc": bofc_pad}


def _weight_spec(shape):
    """Whole-array, single-buffered resident operand (constant index_map)."""
    nd = len(shape)
    return pl.BlockSpec(shape, lambda s: (0,) * nd,
                        pipeline_mode=pl.Buffered(1))


def _vmem_limit_bytes(B, s_tile, D, elem_bytes):
    """Explicit scoped-VMEM budget: tile footprint + headroom, v7x-safe ceiling."""
    stream = 2 * 2 * B * s_tile * D * elem_bytes                  # h1/h2, double-buffered
    weights = (D * D + D + D * 2 * D + 2 * D + D * OUT_PAD + OUT_PAD) * 4  # single-buffered
    out = 2 * B * OUT_PAD * 4
    scratch = 2 * B * D * 4
    need = stream + weights + out + scratch
    # 2x headroom for compiler temporaries; clamp to <= 48 MiB (v7x has 64 MiB VMEM).
    return int(min(max(2 * need, 8 * 1024 * 1024), 48 * 1024 * 1024))


def text_match_forward(h1, h2, fused):
    """h1, h2: (B, S, D) last_hidden_state-like tensors (bf16 or f32). -> (1, B, 1)."""
    B, S, D = h1.shape
    assert S % S_TILE == 0
    elem_bytes = jnp.dtype(h1.dtype).itemsize

    kernel = functools.partial(text_match_kernel, heads=HEADS, seq_len=S)
    out = pl.pallas_call(
        kernel,
        out_shape=jax.ShapeDtypeStruct((B, OUT_PAD), jnp.float32),
        grid_spec=pltpu.PrefetchScalarGridSpec(
            num_scalar_prefetch=0,
            grid=(S // S_TILE,),
            in_specs=[
                pl.BlockSpec((B, S_TILE, D), lambda s: (0, s, 0)),   # h1 tile (streamed)
                pl.BlockSpec((B, S_TILE, D), lambda s: (0, s, 0)),   # h2 tile (streamed)
                _weight_spec((D, D)),                                # wq (scaled)
                _weight_spec((1, D)),                                # bq (scaled)
                _weight_spec((D, 2 * D)),                            # wkv
                _weight_spec((1, 2 * D)),                            # bkv
                _weight_spec((D, OUT_PAD)),                          # wofc (padded)
                _weight_spec((1, OUT_PAD)),                          # bofc (padded)
            ],
            out_specs=pl.BlockSpec((B, OUT_PAD), lambda s: (0, 0)),
            scratch_shapes=[pltpu.VMEM((B, D), jnp.float32),         # sum1 (f32 accum)
                            pltpu.VMEM((B, D), jnp.float32)],        # sum2 (f32 accum)
        ),
        compiler_params=pltpu.CompilerParams(
            dimension_semantics=("arbitrary",),                      # reduction axis
            vmem_limit_bytes=_vmem_limit_bytes(B, S_TILE, D, elem_bytes)),
    )(h1, h2,
      fused["wq"], fused["bq"],
      fused["wkv"], fused["bkv"],
      fused["wofc"], fused["bofc"])

    # Column 0 holds the real logit; match the x1.unsqueeze(0) batch-of-1 output.
    return out[:, :1].reshape(1, B, 1)


# -------------------- deterministic parameter / input setup ------------------
def init_params(key):
    ks = jax.random.split(key, 6)
    s = 1.0 / jnp.sqrt(jnp.float32(DIM))
    return {
        "wq": jax.random.normal(ks[0], (DIM, DIM), jnp.float32) * s,
        "bq": jnp.zeros((1, DIM), jnp.float32),
        "wk": jax.random.normal(ks[1], (DIM, DIM), jnp.float32) * s,
        "bk": jnp.zeros((1, DIM), jnp.float32),
        "wv": jax.random.normal(ks[2], (DIM, DIM), jnp.float32) * s,
        "bv": jnp.zeros((1, DIM), jnp.float32),
        "wo": jax.random.normal(ks[3], (DIM, DIM), jnp.float32) * s,
        "bo": jnp.zeros((1, DIM), jnp.float32),
        "wfc": jax.random.normal(ks[4], (DIM, 1), jnp.float32) * s,
        "bfc": jnp.zeros((1, 1), jnp.float32),
        # BERT stub: deterministic token embedding table
        "embed": jax.random.normal(ks[5], (VOCAB, DIM), jnp.float32) * 0.02,
    }


def encoder_stub(input_ids, attention_mask, params):
    """Deterministic stand-in for bert(...).last_hidden_state -> (B, S, D) bf16."""
    # TODO(synk): real BERT encoder not translatable; embedding + positional ramp
    # used instead (attention_mask unused, matching the original mean(dim=1)).
    # Emits bf16 directly so no standalone HBM cast pass is needed.
    del attention_mask
    emb = params["embed"][input_ids]                               # (B, S, D)
    pos = jnp.arange(input_ids.shape[1], dtype=jnp.float32)[None, :, None] * 0.01
    return (emb + pos).astype(jnp.bfloat16)


def reference_forward(h1, h2, params, heads):
    """Pure-JAX reference of the unfused module math (from the same hidden states)."""
    x1 = jnp.mean(h1.astype(jnp.float32), axis=1)                  # (B, D)
    x2 = jnp.mean(h2.astype(jnp.float32), axis=1)
    B, D = x1.shape
    dh = D // heads
    q = x1 @ params["wq"] + params["bq"]
    k = x2 @ params["wk"] + params["bk"]
    v = x2 @ params["wv"] + params["bv"]
    qh = q.reshape(B, heads, dh).transpose(1, 0, 2)
    kh = k.reshape(B, heads, dh).transpose(1, 0, 2)
    vh = v.reshape(B, heads, dh).transpose(1, 0, 2)
    scores = jnp.einsum('hbd,hcd->hbc', qh, kh) / jnp.sqrt(jnp.float32(dh))
    attn = jax.nn.softmax(scores, axis=-1)
    ctx = jnp.einsum('hbc,hcd->hbd', attn, vh).transpose(1, 0, 2).reshape(B, D)
    out = ctx @ params["wo"] + params["bo"]
    logits = out @ params["wfc"] + params["bfc"]
    return logits.reshape(1, B, 1)


# ------------------------------- main -----------------------------------------
if __name__ == "__main__":
    root = jax.random.PRNGKey(0)
    k_par, k_id1, k_id2 = jax.random.split(root, 3)

    params = init_params(k_par)
    fused = prepare_fused_params(params, HEADS)

    input_ids1 = jax.random.randint(k_id1, (BATCH, SEQ), 0, VOCAB, jnp.int32)
    input_ids2 = jax.random.randint(k_id2, (BATCH, SEQ), 0, VOCAB, jnp.int32)
    attention_mask1 = jnp.ones((BATCH, SEQ), jnp.int32)
    attention_mask2 = jnp.ones((BATCH, SEQ), jnp.int32)

    h1 = encoder_stub(input_ids1, attention_mask1, params)   # (B, S, D) bf16
    h2 = encoder_stub(input_ids2, attention_mask2, params)   # (B, S, D) bf16

    out = text_match_forward(h1, h2, fused)                  # (1, B, 1)
    jax.block_until_ready(out)

    ref = reference_forward(h1, h2, params, HEADS)
    assert out.shape == (1, BATCH, 1)
    assert jnp.all(jnp.isfinite(out))
    assert jnp.allclose(out, ref, rtol=2e-3, atol=2e-3), (out, ref)
    print("KERNEL_OK")
</pallas_src>

<mosaic_0001>
module attributes {stable_mosaic.version = 11 : i64} {
  func.func @text_match_kernel(%arg0: i32, %arg1: memref<2x128x32xbf16, #tpu.memory_space<vmem>>, %arg2: memref<2x128x32xbf16, #tpu.memory_space<vmem>>, %arg3: memref<32x32xf32, #tpu.memory_space<vmem>>, %arg4: memref<1x32xf32, #tpu.memory_space<vmem>>, %arg5: memref<32x64xf32, #tpu.memory_space<vmem>>, %arg6: memref<1x64xf32, #tpu.memory_space<vmem>>, %arg7: memref<32x128xf32, #tpu.memory_space<vmem>>, %arg8: memref<1x128xf32, #tpu.memory_space<vmem>>, %arg9: memref<2x128xf32, #tpu.memory_space<vmem>>, %arg10: memref<2x32xf32, #tpu.memory_space<vmem>>, %arg11: memref<2x32xf32, #tpu.memory_space<vmem>>) attributes {dimension_semantics = [#tpu.dimension_semantics<arbitrary>], iteration_bounds = array<i64: 2>, scalar_prefetch = 0 : i64, scratch_operands = 2 : i64, tpu.core_type = #tpu.core_type<tc>, window_params = [{transform_indices = @transform_0, window_bounds = array<i64: 2, 128, 32>}, {transform_indices = @transform_1, window_bounds = array<i64: 2, 128, 32>}, {pipeline_mode = #tpu.pipeline_mode<synchronous>, transform_indices = @transform_2, window_bounds = array<i64: 32, 32>}, {pipeline_mode = #tpu.pipeline_mode<synchronous>, transform_indices = @transform_3, window_bounds = array<i64: 1, 32>}, {pipeline_mode = #tpu.pipeline_mode<synchronous>, transform_indices = @transform_4, window_bounds = array<i64: 32, 64>}, {pipeline_mode = #tpu.pipeline_mode<synchronous>, transform_indices = @transform_5, window_bounds = array<i64: 1, 64>}, {pipeline_mode = #tpu.pipeline_mode<synchronous>, transform_indices = @transform_6, window_bounds = array<i64: 32, 128>}, {pipeline_mode = #tpu.pipeline_mode<synchronous>, transform_indices = @transform_7, window_bounds = array<i64: 1, 128>}, {pipeline_mode = #tpu.pipeline_mode<synchronous>, transform_indices = @transform_8, window_bounds = array<i64: 2, 128>}]} {
    %c0_i32 = arith.constant 0 : i32
    %0 = arith.cmpi eq, %arg0, %c0_i32 : i32
    %1 = arith.extui %0 : i1 to i32
    %c0_i32_0 = arith.constant 0 : i32
    %2 = arith.cmpi ne, %1, %c0_i32_0 : i32
    scf.if %2 {
      %cst_17 = arith.constant 0.000000e+00 : f32
      %19 = vector.broadcast %cst_17 : f32 to vector<2x32xf32>
      %c0_18 = arith.constant 0 : index
      %c0_19 = arith.constant 0 : index
      %20 = vector.load %arg10[%c0_18, %c0_19] : memref<2x32xf32, #tpu.memory_space<vmem>>, vector<2x32xf32>
      tpu.vector_store %arg10[%c0_18, %c0_19], %19 {strides = array<i32>} : memref<2x32xf32, #tpu.memory_space<vmem>>, vector<2x32xf32>,
      %cst_20 = arith.constant 0.000000e+00 : f32
      %21 = vector.broadcast %cst_20 : f32 to vector<2x32xf32>
      %c0_21 = arith.constant 0 : index
      %c0_22 = arith.constant 0 : index
      %22 = vector.load %arg11[%c0_21, %c0_22] : memref<2x32xf32, #tpu.memory_space<vmem>>, vector<2x32xf32>
      tpu.vector_store %arg11[%c0_21, %c0_22], %21 {strides = array<i32>} : memref<2x32xf32, #tpu.memory_space<vmem>>, vector<2x32xf32>,
    } else {
    }
    %cst = arith.constant 1.000000e+00 : bf16
    %3 = vector.broadcast %cst : bf16 to vector<2x1x128xbf16>
    %c0 = arith.constant 0 : index
    %c0_1 = arith.constant 0 : index
    %4 = vector.load %arg10[%c0, %c0_1] : memref<2x32xf32, #tpu.memory_space<vmem>>, vector<2x32xf32>
    %c0_2 = arith.constant 0 : index
    %c0_3 = arith.constant 0 : index
    %c0_4 = arith.constant 0 : index
    %5 = vector.load %arg1[%c0_2, %c0_3, %c0_4] : memref<2x128x32xbf16, #tpu.memory_space<vmem>>, vector<2x128x32xbf16>
    "tpu.trace_start"() <{level = 10 : i32, message = "bos,bsd->bod"}> : () -> ()
    %cst_5 = arith.constant dense<0.000000e+00> : vector<2x1x32xf32>
    %6 = tpu.matmul %3, %5, %cst_5 {dimension_numbers = #tpu.dot_dimension_numbers<[2], [1], [1], [2], [0, 0, 0, 1, 1, 2], [0], [0]>} : vector<2x1x128xbf16>, vector<2x128x32xbf16>, vector<2x1x32xf32> -> vector<2x1x32xf32>
    "tpu.trace_stop"() : () -> ()
    %7 = vector.shape_cast %6 : vector<2x1x32xf32> to vector<2x32xf32>
    %8 = arith.addf %4, %7 : vector<2x32xf32>
    %c0_6 = arith.constant 0 : index
    %c0_7 = arith.constant 0 : index
    %9 = vector.load %arg10[%c0_6, %c0_7] : memref<2x32xf32, #tpu.memory_space<vmem>>, vector<2x32xf32>
    tpu.vector_store %arg10[%c0_6, %c0_7], %8 {strides = array<i32>} : memref<2x32xf32, #tpu.memory_space<vmem>>, vector<2x32xf32>,
    %c0_8 = arith.constant 0 : index
    %c0_9 = arith.constant 0 : index
    %10 = vector.load %arg11[%c0_8, %c0_9] : memref<2x32xf32, #tpu.memory_space<vmem>>, vector<2x32xf32>
    %c0_10 = arith.constant 0 : index
    %c0_11 = arith.constant 0 : index
    %c0_12 = arith.constant 0 : index
    %11 = vector.load %arg2[%c0_10, %c0_11, %c0_12] : memref<2x128x32xbf16, #tpu.memory_space<vmem>>, vector<2x128x32xbf16>
    "tpu.trace_start"() <{level = 10 : i32, message = "bos,bsd->bod"}> : () -> ()
    %cst_13 = arith.constant dense<0.000000e+00> : vector<2x1x32xf32>
    %12 = tpu.matmul %3, %11, %cst_13 {dimension_numbers = #tpu.dot_dimension_numbers<[2], [1], [1], [2], [0, 0, 0, 1, 1, 2], [0], [0]>} : vector<2x1x128xbf16>, vector<2x128x32xbf16>, vector<2x1x32xf32> -> vector<2x1x32xf32>
    "tpu.trace_stop"() : () -> ()
    %13 = vector.shape_cast %12 : vector<2x1x32xf32> to vector<2x32xf32>
    %14 = arith.addf %10, %13 : vector<2x32xf32>
    %c0_14 = arith.constant 0 : index
    %c0_15 = arith.constant 0 : index
    %15 = vector.load %arg11[%c0_14, %c0_15] : memref<2x32xf32, #tpu.memory_space<vmem>>, vector<2x32xf32>
    tpu.vector_store %arg11[%c0_14, %c0_15], %14 {strides = array<i32>} : memref<2x32xf32, #tpu.memory_space<vmem>>, vector<2x32xf32>,
    %c1_i32 = arith.constant 1 : i32
    %16 = arith.cmpi eq, %arg0, %c1_i32 : i32
    %17 = arith.extui %16 : i1 to i32
    %c0_i32_16 = arith.constant 0 : i32
    %18 = arith.cmpi ne, %17, %c0_i32_16 : i32
    scf.if %18 {
      %cst_17 = arith.constant 1.000000e+00 : f32
      %cst_18 = arith.constant 2.560000e+02 : f32
      %19 = arith.divf %cst_17, %cst_18 : f32
      %c0_19 = arith.constant 0 : index
      %c0_20 = arith.constant 0 : index
      %20 = vector.load %arg10[%c0_19, %c0_20] : memref<2x32xf32, #tpu.memory_space<vmem>>, vector<2x32xf32>
      %21 = vector.broadcast %19 : f32 to vector<2x32xf32>
      %22 = arith.mulf %20, %21 : vector<2x32xf32>
      %c0_21 = arith.constant 0 : index
      %c0_22 = arith.constant 0 : index
      %23 = vector.load %arg11[%c0_21, %c0_22] : memref<2x32xf32, #tpu.memory_space<vmem>>, vector<2x32xf32>
      %24 = vector.broadcast %19 : f32 to vector<2x32xf32>
      %25 = arith.mulf %23, %24 : vector<2x32xf32>
      %c0_23 = arith.constant 0 : index
      %c0_24 = arith.constant 0 : index
      %26 = vector.load %arg3[%c0_23, %c0_24] : memref<32x32xf32, #tpu.memory_space<vmem>>, vector<32x32xf32>
      %cst_25 = arith.constant dense<0.000000e+00> : vector<2x32xf32>
      %27 = tpu.matmul %22, %26, %cst_25 {dimension_numbers = #tpu.dot_dimension_numbers<[1], [0], [0], [1], [0, 0, 1, 1], [], []>} : vector<2x32xf32>, vector<32x32xf32>, vector<2x32xf32> -> vector<2x32xf32>
      %c0_26 = arith.constant 0 : index
      %c0_27 = arith.constant 0 : index
      %28 = vector.load %arg4[%c0_26, %c0_27] : memref<1x32xf32, #tpu.memory_space<vmem>>, vector<1x32xf32>
      %29 = vector.broadcast %28 : vector<1x32xf32> to vector<2x32xf32>
      %30 = arith.addf %27, %29 : vector<2x32xf32>
      %c0_28 = arith.constant 0 : index
      %c0_29 = arith.constant 0 : index
      %31 = vector.load %arg5[%c0_28, %c0_29] : memref<32x64xf32, #tpu.memory_space<vmem>>, vector<32x64xf32>
      %cst_30 = arith.constant dense<0.000000e+00> : vector<2x64xf32>
      %32 = tpu.matmul %25, %31, %cst_30 {dimension_numbers = #tpu.dot_dimension_numbers<[1], [0], [0], [1], [0, 0, 1, 1], [], []>} : vector<2x32xf32>, vector<32x64xf32>, vector<2x64xf32> -> vector<2x64xf32>
      %c0_31 = arith.constant 0 : index
      %c0_32 = arith.constant 0 : index
      %33 = vector.load %arg6[%c0_31, %c0_32] : memref<1x64xf32, #tpu.memory_space<vmem>>, vector<1x64xf32>
      %34 = vector.broadcast %33 : vector<1x64xf32> to vector<2x64xf32>
      %35 = arith.addf %32, %34 : vector<2x64xf32>
      %36 = vector.extract_strided_slice %35 {offsets = [0, 0], sizes = [2, 32], strides = [1, 1]} : vector<2x64xf32> to vector<2x32xf32>
      %37 = vector.extract_strided_slice %35 {offsets = [0, 32], sizes = [2, 32], strides = [1, 1]} : vector<2x64xf32> to vector<2x32xf32>
      %38 = vector.shape_cast %30 : vector<2x32xf32> to vector<2x8x4xf32>
      %39 = tpu.transpose %38, [1, 0, 2] : vector<2x8x4xf32> -> vector<8x2x4xf32>
      %40 = vector.shape_cast %36 : vector<2x32xf32> to vector<2x8x4xf32>
      %41 = tpu.transpose %40, [1, 0, 2] : vector<2x8x4xf32> -> vector<8x2x4xf32>
      %42 = vector.shape_cast %37 : vector<2x32xf32> to vector<2x8x4xf32>
      %43 = tpu.transpose %42, [1, 0, 2] : vector<2x8x4xf32> -> vector<8x2x4xf32>
      "tpu.trace_start"() <{level = 10 : i32, message = "hbd,hcd->hbc"}> : () -> ()
      %cst_33 = arith.constant dense<0.000000e+00> : vector<8x2x2xf32>
      %44 = tpu.matmul %39, %41, %cst_33 {dimension_numbers = #tpu.dot_dimension_numbers<[2], [2], [1], [1], [0, 0, 0, 1, 1, 1], [0], [0]>} : vector<8x2x4xf32>, vector<8x2x4xf32>, vector<8x2x2xf32> -> vector<8x2x2xf32>
      "tpu.trace_stop"() : () -> ()
      %cst_34 = arith.constant dense<0xFF800000> : vector<8x2xf32>
      %45 = vector.multi_reduction <maximumf>, %44, %cst_34 [2] : vector<8x2x2xf32> to vector<8x2xf32>
      %cst_35 = arith.constant 0xFF800000 : f32
      %46 = vector.broadcast %cst_35 : f32 to vector<8x2xf32>
      %47 = arith.maximumf %46, %45 : vector<8x2xf32>
      %48 = vector.shape_cast %47 : vector<8x2xf32> to vector<8x2x1xf32>
      %49 = vector.broadcast %48 : vector<8x2x1xf32> to vector<8x2x2xf32>
      %50 = arith.subf %44, %49 : vector<8x2x2xf32>
      %51 = math.exp %50 : vector<8x2x2xf32>
      %cst_36 = arith.constant dense<0.000000e+00> : vector<8x2xf32>
      %52 = vector.multi_reduction <add>, %51, %cst_36 [2] : vector<8x2x2xf32> to vector<8x2xf32>
      %53 = vector.shape_cast %52 : vector<8x2xf32> to vector<8x2x1xf32>
      %54 = vector.broadcast %53 : vector<8x2x1xf32> to vector<8x2x2xf32>
      %55 = arith.divf %51, %54 : vector<8x2x2xf32>
      "tpu.trace_start"() <{level = 10 : i32, message = "hbc,hcd->hbd"}> : () -> ()
      %cst_37 = arith.constant dense<0.000000e+00> : vector<8x2x4xf32>
      %56 = tpu.matmul %55, %43, %cst_37 {dimension_numbers = #tpu.dot_dimension_numbers<[2], [1], [1], [2], [0, 0, 0, 1, 1, 2], [0], [0]>} : vector<8x2x2xf32>, vector<8x2x4xf32>, vector<8x2x4xf32> -> vector<8x2x4xf32>
      "tpu.trace_stop"() : () -> ()
      %57 = tpu.transpose %56, [1, 0, 2] : vector<8x2x4xf32> -> vector<2x8x4xf32>
      %58 = vector.shape_cast %57 : vector<2x8x4xf32> to vector<2x32xf32>
      %c0_38 = arith.constant 0 : index
      %c0_39 = arith.constant 0 : index
      %59 = vector.load %arg7[%c0_38, %c0_39] : memref<32x128xf32, #tpu.memory_space<vmem>>, vector<32x128xf32>
      %cst_40 = arith.constant dense<0.000000e+00> : vector<2x128xf32>
      %60 = tpu.matmul %58, %59, %cst_40 {dimension_numbers = #tpu.dot_dimension_numbers<[1], [0], [0], [1], [0, 0, 1, 1], [], []>} : vector<2x32xf32>, vector<32x128xf32>, vector<2x128xf32> -> vector<2x128xf32>
      %c0_41 = arith.constant 0 : index
      %c0_42 = arith.constant 0 : index
      %61 = vector.load %arg8[%c0_41, %c0_42] : memref<1x128xf32, #tpu.memory_space<vmem>>, vector<1x128xf32>
      %62 = vector.broadcast %61 : vector<1x128xf32> to vector<2x128xf32>
      %63 = arith.addf %60, %62 : vector<2x128xf32>
      %c0_43 = arith.constant 0 : index
      %c0_44 = arith.constant 0 : index
      %64 = vector.load %arg9[%c0_43, %c0_44] : memref<2x128xf32, #tpu.memory_space<vmem>>, vector<2x128xf32>
      tpu.vector_store %arg9[%c0_43, %c0_44], %63 {strides = array<i32>} : memref<2x128xf32, #tpu.memory_space<vmem>>, vector<2x128xf32>,
    } else {
    }
    return
  }
  func.func @transform_0(%arg0: i32) -> (i32, i32, i32) {
    %c0_i32 = arith.constant 0 : i32
    %c0_i32_0 = arith.constant 0 : i32
    %c0_i32_1 = arith.constant 0 : i32
    return %c0_i32, %arg0, %c0_i32_0 : i32, i32, i32
  }
  func.func @transform_1(%arg0: i32) -> (i32, i32, i32) {
    %c0_i32 = arith.constant 0 : i32
    %c0_i32_0 = arith.constant 0 : i32
    %c0_i32_1 = arith.constant 0 : i32
    return %c0_i32, %arg0, %c0_i32_0 : i32, i32, i32
  }
  func.func @transform_2(%arg0: i32) -> (i32, i32) {
    %c0_i32 = arith.constant 0 : i32
    %c0_i32_0 = arith.constant 0 : i32
    %c0_i32_1 = arith.constant 0 : i32
    return %c0_i32, %c0_i32_0 : i32, i32
  }
  func.func @transform_3(%arg0: i32) -> (i32, i32) {
    %c0_i32 = arith.constant 0 : i32
    %c0_i32_0 = arith.constant 0 : i32
    %c0_i32_1 = arith.constant 0 : i32
    return %c0_i32, %c0_i32_0 : i32, i32
  }
  func.func @transform_4(%arg0: i32) -> (i32, i32) {
    %c0_i32 = arith.constant 0 : i32
    %c0_i32_0 = arith.constant 0 : i32
    %c0_i32_1 = arith.constant 0 : i32
    return %c0_i32, %c0_i32_0 : i32, i32
  }
  func.func @transform_5(%arg0: i32) -> (i32, i32) {
    %c0_i32 = arith.constant 0 : i32
    %c0_i32_0 = arith.constant 0 : i32
    %c0_i32_1 = arith.constant 0 : i32
    return %c0_i32, %c0_i32_0 : i32, i32
  }
  func.func @transform_6(%arg0: i32) -> (i32, i32) {
    %c0_i32 = arith.constant 0 : i32
    %c0_i32_0 = arith.constant 0 : i32
    %c0_i32_1 = arith.constant 0 : i32
    return %c0_i32, %c0_i32_0 : i32, i32
  }
  func.func @transform_7(%arg0: i32) -> (i32, i32) {
    %c0_i32 = arith.constant 0 : i32
    %c0_i32_0 = arith.constant 0 : i32
    %c0_i32_1 = arith.constant 0 : i32
    return %c0_i32, %c0_i32_0 : i32, i32
  }
  func.func @transform_8(%arg0: i32) -> (i32, i32) {
    %c0_i32 = arith.constant 0 : i32
    %c0_i32_0 = arith.constant 0 : i32
    %c0_i32_1 = arith.constant 0 : i32
    return %c0_i32, %c0_i32_0 : i32, i32
  }
}

</mosaic_0001>

<bundles_post_ra>
// kernel: tpu_custom_call.1
= control target key start
LH: loop header
LB: loop body
LE: loop exit
PB: predicated region body
PF: predicated region fallthrough
CT: control target
= control target key end

     0   :  { %13 = vsyncpa [#allocation7], 0  ;;  %s2670_s27 = smov 0   ;;  %s2672_s28 = smov 0   ;;  %s3229_s0 = inlined_call_operand.vmem [shape: bf16[2,256,32], index: 0, kind: input, shape index: {}]   ;;  %s3230_s1 = inlined_call_operand.vmem [shape: bf16[2,256,32], index: 1, kind: input, shape index: {}]   ;;  %s3231_s2 = inlined_call_operand.vmem [shape: f32[32,32], index: 2, kind: input, shape index: {}]   ;;  %s3232_s3 = inlined_call_operand.vmem [shape: f32[1,32], index: 3, kind: input, shape index: {}]   ;;  %s3233_s4 = inlined_call_operand.vmem [shape: f32[32,64], index: 4, kind: input, shape index: {}]   ;;  %s3234_s5 = inlined_call_operand.vmem [shape: f32[1,64], index: 5, kind: input, shape index: {}]   ;;  %s3235_s6 = inlined_call_operand.vmem [shape: f32[32,128], index: 6, kind: input, shape index: {}]   ;;  %s3236_s7 = inlined_call_operand.vmem [shape: f32[1,128], index: 7, kind: input, shape index: {}]   ;;  %s3237_s8 = inlined_call_operand.hbm [shape: f32[2,128], index: 8, kind: output, shape index: {}]  }
   0x1   :  { %s2674_s29 = smov 0  }
   0x2 LB: > { %s2686_s30 = sadd.s32 4294967295, %s2603_s29   ;;  %s2689_s9 = sadd.s32 1, %s2603_s29   ;;  %s2603_s29 = sphi %s2674_s29, %s3259_s29   ;;  %s2599_s28 = sphi %s2672_s28, %s3258_s28   ;;  %s2595_s27 = sphi %s2670_s27, %s3257_s27  }
   0x3   : > { %s23_s10 = ssub.s32 %s2603_s29, %s2689_s9  ;;  %s26_s11 = sadd.s32 1, %s2599_s28 }
   0x4   : > { %p24_p0 = scmp.eq.s32.totalorder %s23_s10, 0  ;;  %p33_p1 = scmp.ne.s32.totalorder %s2599_s28, %s2595_s27 }
   0x5   : > { %p34_p2 = scmp.eq.s32.totalorder %s2603_s29, 0  ;;  %p2251_p4 = scmp.ge.s32.totalorder %s2603_s29, 2 }
   0x6   : > { %s2698_s12 = scalar_select %p24_p0, %s2599_s28, %s26_s11  }
   0x7   : > { %p2700_p3 = por %p34_p2, %p33_p1  ;;  %250 = sbr.rel (%p2251_p4) target bundleno = 52 (0x34), region = 40 }
   0xc   : > { %253 = sbr.rel (!%p2700_p3) target bundleno = 32 (0x20), region = 44  ;;  %s255_s14 = sand.u32 (%p2700_p3), 1, %s2599_s28  }
   0xd   : > { %s2430_s15 = sshll.u32 (%p2700_p3), %s2603_s29, 6  ;;  %s2252_s16 = sshll.u32 (%p2700_p3), %s255_s14, 7 }
   0xe   : > { %s2712_s19 = scalar_lea.vmem (%p2700_p3), %s3229_s0, %s2430_s15  ;;  %s257_s20 = scalar_lea.vmem (%p2700_p3), [#allocation4], %s2252_s16 }
   0xf   : > { %v277_v0 = vld [vmem:[%s2712_s19] sm:$0xff] (%p2700_p3)   ;;  %v281_v1 = vld [vmem:[%s2712_s19 + $0x8] sm:$0xff] (%p2700_p3)   ;;  %v285_v2 = vld [vmem:[%s2712_s19 + $0x10] sm:$0xff] (%p2700_p3)  }
  0x10   : > { %278 = vst [vmem:[%s257_s20] sm:$0xff] (%p2700_p3), %v277_v0   ;;  %v289_v3 = vld [vmem:[%s2712_s19 + $0x18] sm:$0xff] (%p2700_p3)   ;;  %v293_v4 = vld [vmem:[%s2712_s19 + $0x20] sm:$0xff] (%p2700_p3)   ;;  %v297_v5 = vld [vmem:[%s2712_s19 + $0x28] sm:$0xff] (%p2700_p3)  }
  0x11   : > { %282 = vst [vmem:[%s257_s20 + $0x8] sm:$0xff] %v281_v1   ;;  %v301_v6 = vld [vmem:[%s2712_s19 + $0x30] sm:$0xff]   ;;  %v305_v7 = vld [vmem:[%s2712_s19 + $0x38] sm:$0xff]   ;;  %v309_v8 = vld [vmem:[%s2712_s19 + $0x80] sm:$0xff]  }
  0x12   : > { %286 = vst [vmem:[%s257_s20 + $0x10] sm:$0xff] %v285_v2   ;;  %v313_v9 = vld [vmem:[%s2712_s19 + $0x88] sm:$0xff]   ;;  %v317_v10 = vld [vmem:[%s2712_s19 + $0x90] sm:$0xff]   ;;  %v321_v11 = vld [vmem:[%s2712_s19 + $0x98] sm:$0xff]  }
  0x13   : > { %290 = vst [vmem:[%s257_s20 + $0x18] sm:$0xff] %v289_v3   ;;  %v325_v12 = vld [vmem:[%s2712_s19 + $0xa0] sm:$0xff]   ;;  %v329_v13 = vld [vmem:[%s2712_s19 + $0xa8] sm:$0xff]   ;;  %v333_v14 = vld [vmem:[%s2712_s19 + $0xb0] sm:$0xff]  }
  0x14   : > { %294 = vst [vmem:[%s257_s20 + $0x20] sm:$0xff] %v293_v4   ;;  %v337_v15 = vld [vmem:[%s2712_s19 + $0xb8] sm:$0xff]  }
  0x15   : > { %298 = vst [vmem:[%s257_s20 + $0x28] sm:$0xff] %v297_v5  }
  0x16   : > { %302 = vst [vmem:[%s257_s20 + $0x30] sm:$0xff] %v301_v6  }
  0x17   : > { %306 = vst [vmem:[%s257_s20 + $0x38] sm:$0xff] %v305_v7  }
  0x18   : > { %310 = vst [vmem:[%s257_s20 + $0x40] sm:$0xff] %v309_v8  }
  0x19   : > { %314 = vst [vmem:[%s257_s20 + $0x48] sm:$0xff] %v313_v9  }
  0x1a   : > { %318 = vst [vmem:[%s257_s20 + $0x50] sm:$0xff] %v317_v10  }
  0x1b   : > { %322 = vst [vmem:[%s257_s20 + $0x58] sm:$0xff] %v321_v11  }
  0x1c   : > { %326 = vst [vmem:[%s257_s20 + $0x60] sm:$0xff] %v325_v12  }
  0x1d   : > { %330 = vst [vmem:[%s257_s20 + $0x68] sm:$0xff] %v329_v13  }
  0x1e   : > { %334 = vst [vmem:[%s257_s20 + $0x70] sm:$0xff] %v333_v14  }
  0x1f   : > { %338 = vst [vmem:[%s257_s20 + $0x78] sm:$0xff] %v337_v15  }
  0x20 PF: > { %428 = sbr.rel (!%p2700_p3) target bundleno = 52 (0x34), region = 85  ;;  %s430_s21 = sand.u32 (%p2700_p3), 1, %s2599_s28  }
  0x21   : > { %s2431_s22 = sshll.u32 (%p2700_p3), %s2603_s29, 6  ;;  %s2255_s23 = sshll.u32 (%p2700_p3), %s430_s21, 7 }
  0x22   : > { %s2737_s26 = scalar_lea.vmem (%p2700_p3), %s3230_s1, %s2431_s22  ;;  %s432_s10 = scalar_lea.vmem (%p2700_p3), [#allocation5], %s2255_s23 }
  0x23   : > { %v452_v16 = vld [vmem:[%s2737_s26] sm:$0xff] (%p2700_p3)   ;;  %v456_v17 = vld [vmem:[%s2737_s26 + $0x8] sm:$0xff] (%p2700_p3)   ;;  %v460_v18 = vld [vmem:[%s2737_s26 + $0x10] sm:$0xff] (%p2700_p3)  }
  0x24   : > { %453 = vst [vmem:[%s432_s10] sm:$0xff] (%p2700_p3), %v452_v16   ;;  %v464_v19 = vld [vmem:[%s2737_s26 + $0x18] sm:$0xff] (%p2700_p3)   ;;  %v468_v20 = vld [vmem:[%s2737_s26 + $0x20] sm:$0xff] (%p2700_p3)   ;;  %v472_v21 = vld [vmem:[%s2737_s26 + $0x28] sm:$0xff] (%p2700_p3)  }
  0x25   : > { %457 = vst [vmem:[%s432_s10 + $0x8] sm:$0xff] %v456_v17   ;;  %v476_v22 = vld [vmem:[%s2737_s26 + $0x30] sm:$0xff]   ;;  %v480_v23 = vld [vmem:[%s2737_s26 + $0x38] sm:$0xff]   ;;  %v484_v24 = vld [vmem:[%s2737_s26 + $0x80] sm:$0xff]  }
  0x26   : > { %461 = vst [vmem:[%s432_s10 + $0x10] sm:$0xff] %v460_v18   ;;  %v488_v25 = vld [vmem:[%s2737_s26 + $0x88] sm:$0xff]   ;;  %v492_v26 = vld [vmem:[%s2737_s26 + $0x90] sm:$0xff]   ;;  %v496_v27 = vld [vmem:[%s2737_s26 + $0x98] sm:$0xff]  }
  0x27   : > { %465 = vst [vmem:[%s432_s10 + $0x18] sm:$0xff] %v464_v19   ;;  %v500_v28 = vld [vmem:[%s2737_s26 + $0xa0] sm:$0xff]   ;;  %v504_v29 = vld [vmem:[%s2737_s26 + $0xa8] sm:$0xff]   ;;  %v508_v30 = vld [vmem:[%s2737_s26 + $0xb0] sm:$0xff]  }
  0x28   : > { %469 = vst [vmem:[%s432_s10 + $0x20] sm:$0xff] %v468_v20   ;;  %v512_v31 = vld [vmem:[%s2737_s26 + $0xb8] sm:$0xff]  }
  0x29   : > { %473 = vst [vmem:[%s432_s10 + $0x28] sm:$0xff] %v472_v21  }
  0x2a   : > { %477 = vst [vmem:[%s432_s10 + $0x30] sm:$0xff] %v476_v22  }
  0x2b   : > { %481 = vst [vmem:[%s432_s10 + $0x38] sm:$0xff] %v480_v23  }
  0x2c   : > { %485 = vst [vmem:[%s432_s10 + $0x40] sm:$0xff] %v484_v24  }
  0x2d   : > { %489 = vst [vmem:[%s432_s10 + $0x48] sm:$0xff] %v488_v25  }
  0x2e   : > { %493 = vst [vmem:[%s432_s10 + $0x50] sm:$0xff] %v492_v26  }
  0x2f   : > { %497 = vst [vmem:[%s432_s10 + $0x58] sm:$0xff] %v496_v27  }
  0x30   : > { %501 = vst [vmem:[%s432_s10 + $0x60] sm:$0xff] %v500_v28  }
  0x31   : > { %505 = vst [vmem:[%s432_s10 + $0x68] sm:$0xff] %v504_v29  }
  0x32   : > { %509 = vst [vmem:[%s432_s10 + $0x70] sm:$0xff] %v508_v30  }
  0x33   : > { %513 = vst [vmem:[%s432_s10 + $0x78] sm:$0xff] %v512_v31  }
  0x34 PF: > { %p2258_p5 = scmp.ge.s32.totalorder %s2603_s29, 1  ;;  %p602_p6 = scmp.lt.s32.totalorder %s2603_s29, 3 }
  0x36   : > { %p603_p7 = pnand %p2258_p5, %p602_p6 }
  0x37   : > { %s609_s11 = sand.u32 (!%p603_p7), 1, %s2595_s27   ;;  %p2261_p8 = scmp.ne.s32.totalorder (!%p603_p7), %s2686_s30, 0 }
  0x38   : > { %606 = sbr.rel (%p603_p7) target bundleno = 1385 (0x569), region = 126  ;;  %s2259_s13 = sshll.u32 (!%p603_p7), %s609_s11, 7 }
  0x39   : > { %s2758_s14 = scalar_lea.vmem (!%p603_p7), [#allocation4], %s2259_s13  ;;  %s2760_s15 = scalar_lea.vmem (!%p603_p7), [#allocation5], %s2259_s13 }
  0x3d   : > { %654 = sbr.rel (%p2261_p8) target bundleno = 69 (0x45), region = 138 }
  0x42   : > { %vm655_vm0 = vcmask 254976   ;;  %v2605_v32 = vmov 0.0  }
  0x43   : > { %656 = vst.msk [vmem:[#allocation2] sm:$0x3] %vm655_vm0, %v2605_v32 }
  0x44   : > { %657 = vst.msk [vmem:[#allocation3] sm:$0x3] %vm655_vm0, %v2605_v32 }
  0x45 PF: > { %v2439_v33 = vld [vmem:[%s2758_s14 + $0x38] sm:$0xff]  ;;  %v2438_v37 = vld [vmem:[%s2758_s14 + $0x30] sm:$0xff]  ;;  %v2437_v41 = vld [vmem:[%s2758_s14 + $0x28] sm:$0xff]  ;;  %v2606_v1 = vmov 1065369472   ;;  %vm816_vm1 = vcmask 1041409  }
  0x46   : > { %v2447_v34 = vld [vmem:[%s2758_s14 + $0x78] sm:$0xff]  ;;  %739 = vmatpush.bf16.msra.mxu0 %v2439_v33  ;;  %v2446_v38 = vld [vmem:[%s2758_s14 + $0x70] sm:$0xff]  ;;  %v2445_v42 = vld [vmem:[%s2758_s14 + $0x68] sm:$0xff]  ;;  %vm820_vm2 = vcmask 254976   ;;  %p2390_p9 = scmp.ne.s32.totalorder %s2686_s30, 1 }
  0x47   : > { %v2455_v35 = vld [vmem:[%s2760_s15 + $0x38] sm:$0xff]  ;;  %800 = vmatpush.bf16.msra.mxu1 %v2447_v34  ;;  %v2454_v39 = vld [vmem:[%s2760_s15 + $0x30] sm:$0xff]  ;;  %v2453_v43 = vld [vmem:[%s2760_s15 + $0x28] sm:$0xff]  ;;  %s2607_s16 = smov (!%p2390_p9), 120   ;;  %s2608_s17 = smov (!%p2390_p9), 116  }
  0x48   : > { %v2463_v36 = vld [vmem:[%s2760_s15 + $0x78] sm:$0xff]  ;;  %903 = vmatpush.bf16.msra.mxu2 %v2455_v35  ;;  %v2462_v40 = vld [vmem:[%s2760_s15 + $0x70] sm:$0xff]  ;;  %v2461_v44 = vld [vmem:[%s2760_s15 + $0x68] sm:$0xff]  ;;  %s2609_s18 = smov (!%p2390_p9), 100   ;;  %s2610_s19 = smov (!%p2390_p9), 124  }
  0x49   : > { %964 = vmatpush.bf16.msra.mxu3 %v2463_v36  ;;  %v2436_v45 = vld [vmem:[%s2758_s14 + $0x20] sm:$0xff]  ;;  %v2435_v49 = vld [vmem:[%s2758_s14 + $0x18] sm:$0xff]  ;;  %v2434_v53 = vld [vmem:[%s2758_s14 + $0x10] sm:$0xff]  ;;  %s2611_s20 = smov (!%p2390_p9), 108   ;;  %s2612_s21 = smov (!%p2390_p9), 104  }
  0x4a   : > { %740 = vmatpush.bf16.msra.mxu0 %v2438_v37  ;;  %v2444_v46 = vld [vmem:[%s2758_s14 + $0x60] sm:$0xff]  ;;  %v2443_v50 = vld [vmem:[%s2758_s14 + $0x58] sm:$0xff]  ;;  %v2442_v54 = vld [vmem:[%s2758_s14 + $0x50] sm:$0xff]  ;;  %s2613_s22 = smov (!%p2390_p9), 112   ;;  %s2614_s23 = smov (!%p2390_p9), 96  }
  0x4b   : > { %801 = vmatpush.bf16.msra.mxu1 %v2446_v38  ;;  %v2452_v47 = vld [vmem:[%s2760_s15 + $0x20] sm:$0xff]  ;;  %v2451_v51 = vld [vmem:[%s2760_s15 + $0x18] sm:$0xff]  ;;  %v2450_v55 = vld [vmem:[%s2760_s15 + $0x10] sm:$0xff]  ;;  %s2617_s24 = smov (!%p2390_p9), 8   ;;  %s2618_s25 = smov (!%p2390_p9), 4  }
  0x4c   : > { %904 = vmatpush.bf16.msra.mxu2 %v2454_v39  ;;  %v2460_v48 = vld [vmem:[%s2760_s15 + $0x60] sm:$0xff]  ;;  %v2459_v52 = vld [vmem:[%s2760_s15 + $0x58] sm:$0xff]  ;;  %v2458_v56 = vld [vmem:[%s2760_s15 + $0x50] sm:$0xff]  ;;  %s2619_s26 = smov (!%p2390_p9), 12   ;;  %s2620_s10 = smov (!%p2390_p9), 16  }
  0x4d   : > { %965 = vmatpush.bf16.msra.mxu3 %v2462_v40  ;;  %v2433_v57 = vld [vmem:[%s2758_s14 + $0x8] sm:$0xff]  ;;  %v2432_v61 = vld [vmem:[%s2758_s14] sm:$0xff]  ;;  %v658_v4 = vld [vmem:[#allocation2] sm:$0x3]  ;;  %s2621_s11 = smov (!%p2390_p9), 20   ;;  %s2622_s13 = smov (!%p2390_p9), 24  }
  0x4e   : > { %741 = vmatpush.bf16.msra.mxu0 %v2437_v41  ;;  %v2441_v58 = vld [vmem:[%s2758_s14 + $0x48] sm:$0xff]  ;;  %v2440_v62 = vld [vmem:[%s2758_s14 + $0x40] sm:$0xff]  ;;  %v822_v10 = vld [vmem:[#allocation3] sm:$0x3]  ;;  %s2623_s14 = smov (!%p2390_p9), 28  }
  0x4f   : > { %802 = vmatpush.bf16.msra.mxu1 %v2445_v42  ;;  %v2449_v59 = vld [vmem:[%s2760_s15 + $0x8] sm:$0xff]  ;;  %v2448_v63 = vld [vmem:[%s2760_s15] sm:$0xff] }
  0x50   : > { %905 = vmatpush.bf16.msra.mxu2 %v2453_v43  ;;  %v2457_v60 = vld [vmem:[%s2760_s15 + $0x48] sm:$0xff]  ;;  %v2456_v0 = vld [vmem:[%s2760_s15 + $0x40] sm:$0xff] }
  0x51   : > { %966 = vmatpush.bf16.msra.mxu3 %v2461_v44 }
  0x52   : > { %742 = vmatpush.bf16.msra.mxu0 %v2436_v45 }
  0x53   : > { %803 = vmatpush.bf16.msra.mxu1 %v2444_v46 }
  0x54   : > { %906 = vmatpush.bf16.msra.mxu2 %v2452_v47 }
  0x55   : > { %967 = vmatpush.bf16.msra.mxu3 %v2460_v48 }
  0x56   : > { %743 = vmatpush.bf16.msra.mxu0 %v2435_v49 }
  0x57   : > { %804 = vmatpush.bf16.msra.mxu1 %v2443_v50 }
  0x58   : > { %907 = vmatpush.bf16.msra.mxu2 %v2451_v51 }
  0x59   : > { %968 = vmatpush.bf16.msra.mxu3 %v2459_v52 }
  0x5a   : > { %744 = vmatpush.bf16.msra.mxu0 %v2434_v53 }
  0x5b   : > { %805 = vmatpush.bf16.msra.mxu1 %v2442_v54 }
  0x5c   : > { %908 = vmatpush.bf16.msra.mxu2 %v2450_v55 }
  0x5d   : > { %969 = vmatpush.bf16.msra.mxu3 %v2458_v56 }
  0x5e   : > { %745 = vmatpush.bf16.msra.mxu0 %v2433_v57 }
  0x5f   : > { %806 = vmatpush.bf16.msra.mxu1 %v2441_v58 }
  0x60   : > { %909 = vmatpush.bf16.msra.mxu2 %v2449_v59 }
  0x61   : > { %970 = vmatpush.bf16.msra.mxu3 %v2457_v60 }
  0x62   : > { %746 = vmatpush.bf16.msra.mxu0 %v2432_v61 }
  0x63   : > { %807 = vmatpush.bf16.msra.mxu1 %v2440_v62 }
  0x64   : > { %910 = vmatpush.bf16.msra.mxu2 %v2448_v63 }
  0x65   : > { %971 = vmatpush.bf16.msra.mxu3 %v2456_v0  ;;  %747 = vmatmul.bf16.vlgmr.msra.gmra.mxu0 %v2606_v1 }
  0x66   : > { %808 = vmatmul.bf16.vlgmr.msra.gmra.mxu1 %v2606_v1 }
  0x67   : > { %911 = vmatmul.bf16.vlgmr.msra.gmra.mxu2 %v2606_v1 }
  0x68   : > { %972 = vmatmul.bf16.vlgmr.msra.gmra.mxu3 %v2606_v1 }
  0xe2   : > { %v748_v2 = vpop.f32.mrf.mxu0 }
  0xe3   : > { %v809_v3 = vpop.f32.mrf.mxu1 }
  0xe4   : > { %v815_v5 = vrot.slane %v809_v3, 7 }
  0xe6   : > { %v817_v6 = vsel %vm816_vm1, %v815_v5, %v748_v2 }
  0xe7   : > { %v819_v7 = vadd.f32 %v817_v6, %v658_v4 }
  0xe9   : > { %821 = vst.msk [vmem:[#allocation2] sm:$0x3] %vm820_vm2, %v819_v7 }
  0xea   : > { %v912_v8 = vpop.f32.mrf.mxu2  ;;  %v750_v12 = vpop.f32.mrf.mxu0 }
  0xeb   : > { %v973_v9 = vpop.f32.mrf.mxu3  ;;  %v811_v13 = vpop.f32.mrf.mxu1 }
  0xec   : > { %v979_v11 = vrot.slane %v973_v9, 7 }
  0xee   : > { %v980_v14 = vsel %vm816_vm1, %v979_v11, %v912_v8 }
  0xef   : > { %v982_v15 = vadd.f32 %v980_v14, %v822_v10  ;;  %987 = sbr.rel (%p2390_p9) target bundleno = 1380 (0x564), region = 142 }
  0xf1   : > { %983 = vst.msk [vmem:[#allocation3] sm:$0x3] %vm820_vm2, %v982_v15 }
  0xf2   : > { %v914_v16 = vpop.f32.mrf.mxu2 }
  0xf3   : > { %v975_v17 = vpop.f32.mrf.mxu3 }
  0xf4   : > { %v995_v18 = vld [vmem:[%s3231_s2 + $0x18] sm:$0xff]  ;;  %v994_v20 = vld [vmem:[%s3231_s2 + $0x10] sm:$0xff]  ;;  %v993_v22 = vld [vmem:[%s3231_s2 + $0x8] sm:$0xff]  ;;  %vm1000_vm3 = vcmask 261120   ;;  %v2615_v40 = vmov 1983009808  }
  0xf5   : > { %v1027_v19 = vld [vmem:[%s3233_s4 + $0x18] sm:$0xff]  ;;  %1016 = vmatpush.msra.mxu0 %v995_v18  ;;  %v1026_v21 = vld [vmem:[%s3233_s4 + $0x10] sm:$0xff]  ;;  %v1025_v23 = vld [vmem:[%s3233_s4 + $0x8] sm:$0xff]  ;;  %v1081_v41 = vunpack.c.l.s4 %v2615_v40  ;;  %vm1078_vm4 = vcmask 1047556   ;;  %v2616_v55 = vmov 1934713408  }
  0xf6   : > { %1047 = vmatpush.msra.mxu1 %v1027_v19  ;;  %v988_v24 = vld [vmem:[#allocation2] sm:$0x3]  ;;  %v1105_v56 = vunpack.c.l.s4 %v2616_v55  ;;  %vm1400_vm5 = vcmask 31744   ;;  %vm1609_vm6 = vcmask 9216   ;;  %vm1806_vm7 = vcmask 1041408  }
  0xf7   : > { %1017 = vmatpush.msra.mxu0 %v994_v20  ;;  %v992_v26 = vld [vmem:[%s3231_s2] sm:$0xff]  ;;  %v989_v28 = vmul.f32 0.00390625, %v988_v24  ;;  %v2853_v46 = vunpack.c.0.s8 %v1081_v41  ;;  %vm1802_vm15 = vcmask 15360  }
  0xf8   : > { %1048 = vmatpush.msra.mxu1 %v1026_v21  ;;  %v990_v25 = vld [vmem:[#allocation3] sm:$0x3]  ;;  %v2514_v30 = vld [vmem:[%s3232_s3] ss:$0 sm:$0xff]  ;;  %v2862_v62 = vunpack.c.0.s8 %v1105_v56 }
  0xf9   : > { %v1024_v27 = vld [vmem:[%s3233_s4] sm:$0xff]  ;;  %v991_v29 = vmul.f32 0.00390625, %v990_v25  ;;  %1018 = vmatpush.msra.mxu0 %v993_v22 }
  0xfa   : > { %1049 = vmatpush.msra.mxu1 %v1025_v23  ;;  %v2515_v31 = vld [vmem:[%s3234_s5] ss:$0 sm:$0xff] }
  0xfb   : > { %1019 = vmatpush.msra.mxu0 %v992_v26 }
  0xfc   : > { %1050 = vmatpush.msra.mxu1 %v1024_v27  ;;  %2391 = vmatmul.msk.f32.vlgmr.msra.gmra.mxu0 %vm1000_vm3, %v989_v28 }
  0xfd   : > { %2392 = vmatmul.msk.f32.vlgmr.msra.gmra.mxu1 %vm1000_vm3, %v991_v29 }
 0x179   : > { %v1021_v32 = vpop.f32.mrf.mxu0 }
 0x17a   : > { %v1052_v33 = vpop.f32.mrf.mxu1  ;;  %v2828_v34 = vadd.f32 %v2514_v30, %v1021_v32 }
 0x17b   : > { %v2830_v35 = vadd.f32 %v2515_v31, %v1052_v33 }
 0x17c   : > { %1062 = vrot.lane.b32.xlu2 %v2828_v34, %s2608_s17 }
 0x17d   : > { %1174 = vrot.lane.b32.xlu1 %v2830_v35, %s2607_s16  ;;  %1177 = vrot.lane.b32.xlu0 %v2830_v35, %s2608_s17 }
 0x184   : > { %1183 = vrot.lane.b32.xlu2 %v2830_v35, %s2611_s20 }
 0x185   : > { %1189 = vrot.lane.b32.xlu1 %v2830_v35, %s2609_s18  ;;  %1171 = vrot.lane.b32.xlu0 %v2830_v35, %s2610_s19 }
 0x18c   : > { %1059 = vrot.lane.b32.xlu2 %v2828_v34, %s2607_s16 }
 0x18d   : > { %1186 = vrot.lane.b32.xlu0 %v2830_v35, %s2612_s21  ;;  %1056 = vrot.lane.b32.xlu1 %v2828_v34, %s2610_s19 }
 0x194   : > { %1068 = vrot.lane.b32.xlu2 %v2828_v34, %s2611_s20 }
 0x195   : > { %1074 = vrot.lane.b32.xlu0 %v2828_v34, %s2609_s18  ;;  %1180 = vrot.lane.b32.xlu1 %v2830_v35, %s2613_s22 }
 0x19d   : > { %1071 = vrot.lane.b32.xlu0 %v2828_v34, %s2612_s21  ;;  %1065 = vrot.lane.b32.xlu1 %v2828_v34, %s2613_s22 }
 0x1d6   : > { %v1063_v36 = vpop.permute.xlu2 %1062 }
 0x1d7   : > { %v1084_v52 = vrot.slane %v1063_v36, 4 }
 0x1de   : > { %v1184_v37 = vpop.permute.xlu2 %1183 }
 0x1df   : > { %1294 = vrot.lane.b32.xlu2 %v1184_v37, %s2614_s23 }
 0x1e6   : > { %v1060_v53 = vpop.permute.xlu2 %1059 }
 0x1e7   : > { %v1077_v61 = vrot.slane %v1060_v53, 4 }
 0x1e9   : > { %v1079_v5 = vsel %vm1078_vm4, %v1077_v61, %v2828_v34 }
 0x1ea   : > { %v1083_v13 = vperm.slane %v1079_v5, %v2853_v46 }
 0x1ee   : > { %v1069_v12 = vpop.permute.xlu2 %1068 }
 0x1ef   : > { %v1175_v38 = vpop.permute.xlu1 %1174  ;;  %v1178_v39 = vpop.permute.xlu0 %1177 }
 0x1f0   : > { %1290 = vrot.lane.b32.xlu1 %v1178_v39, %s2614_s23  ;;  %v1198_v44 = vrot.slane %v1178_v39, 4  ;;  %v1192_v47 = vrot.slane %v1175_v38, 4 }
 0x1f2   : > { %v1193_v54 = vsel %vm1078_vm4, %v1192_v47, %v2830_v35 }
 0x1f3   : > { %v1197_v60 = vperm.slane %v1193_v54, %v2853_v46 }
 0x1f7   : > { %v1190_v42 = vpop.permute.xlu1 %1189  ;;  %v2848_v43 = vpop.permute.xlu0 %1171 }
 0x1f8   : > { %1298 = vrot.lane.b32.xlu0 %v1190_v42, %s2614_s23  ;;  %v1199_v45 = vsel %vm1078_vm4, %v1198_v44, %v2848_v43  ;;  %v1210_v49 = vrot.slane %v1190_v42, 4 }
 0x1f9   : > { %v1203_v48 = vperm.slane %v1199_v45, %v2853_v46 }
 0x1fa   : > { %v1211_v58 = vsel %vm1078_vm4, %v1210_v49, %v1184_v37 }
 0x1fb   : > { %v1216_v57 = vrot.slane %v1203_v48, 4  ;;  %v1215_v63 = vperm.slane %v1211_v58, %v2853_v46 }
 0x1fd   : > { %v1217_v0 = vsel %vm1078_vm4, %v1216_v57, %v1197_v60  ;;  %v1222_v9 = vrot.slane %v1215_v63, 4 }
 0x1fe   : > { %v1221_v6 = vperm.slane %v1217_v0, %v2862_v62 }
 0x1ff   : > { %v1187_v50 = vpop.permute.xlu0 %1186  ;;  %v1057_v51 = vpop.permute.xlu1 %1056 }
 0x200   : > { %1296 = vrot.lane.b32.xlu0 %v1187_v50, %s2614_s23  ;;  %v1085_v59 = vsel %vm1078_vm4, %v1084_v52, %v1057_v51  ;;  %v1204_v2 = vrot.slane %v1187_v50, 4  ;;  %v1230_v16 = vrot.slane %v1221_v6, 4 }
 0x201   : > { %v1089_v1 = vperm.slane %v1085_v59, %v2853_v46 }
 0x203   : > { %v1102_v10 = vrot.slane %v1089_v1, 4 }
 0x205   : > { %v1103_v18 = vsel %vm1078_vm4, %v1102_v10, %v1083_v13 }
 0x206   : > { %v1107_v25 = vperm.slane %v1103_v18, %v2862_v62 }
 0x207   : > { %v1075_v3 = vpop.permute.xlu0 %1074  ;;  %v2867_v4 = vpop.permute.xlu1 %1180 }
 0x208   : > { %v1096_v7 = vrot.slane %v1075_v3, 4  ;;  %v1205_v8 = vsel %vm1078_vm4, %v1204_v2, %v2867_v4  ;;  %1288 = vrot.lane.b32.xlu0 %v1175_v38, %s2614_s23  ;;  %v1116_v45 = vrot.slane %v1107_v25, 4 }
 0x209   : > { %v1209_v11 = vperm.slane %v1205_v8, %v2853_v46 }
 0x20a   : > { %v1097_v14 = vsel %vm1078_vm4, %v1096_v7, %v1069_v12 }
 0x20b   : > { %v1223_v15 = vsel %vm1078_vm4, %v1222_v9, %v1209_v11  ;;  %v1101_v19 = vperm.slane %v1097_v14, %v2853_v46 }
 0x20c   : > { %v1227_v17 = vperm.slane %v1223_v15, %v2862_v62 }
 0x20d   : > { %v1108_v33 = vrot.slane %v1101_v19, 4 }
 0x20e   : > { %v1228_v20 = vrot.slane %v1227_v17, 4  ;;  %v1231_v21 = vsel %vm1078_vm4, %v1227_v17, %v1230_v16 }
 0x20f   : > { %v1072_v22 = vpop.permute.xlu0 %1071  ;;  %v1242_v23 = vrot.slane %v1231_v21, 4  ;;  %v1247_v24 = vperm.slane %v1231_v21, %v2853_v46  ;;  %v1066_v28 = vpop.permute.xlu1 %1065 }
 0x210   : > { %v1090_v26 = vrot.slane %v1072_v22, 4  ;;  %v1229_v27 = vsel %vm1078_vm4, %v1228_v20, %v1221_v6 }
 0x211   : > { %v1232_v29 = vrot.slane %v1229_v27, 4  ;;  %v1237_v30 = vperm.slane %v1229_v27, %v2853_v46  ;;  %v1252_v31 = vrot.slane %v1247_v24, 4  ;;  %v1243_v32 = vsel %vm1078_vm4, 0.0, %v1242_v23 }
 0x212   : > { %v1091_v34 = vsel %vm1078_vm4, %v1090_v26, %v1066_v28  ;;  %v1251_v36 = vperm.slane %v1243_v32, %v2853_v46 }
 0x213   : > { %v1095_v37 = vperm.slane %v1091_v34, %v2853_v46  ;;  %v1253_v38 = vsel %vm1078_vm4, %v1252_v31, %v1237_v30  ;;  %v1254_v39 = vrot.slane %v1237_v30, 4  ;;  %v1233_v40 = vsel %vm1078_vm4, 0.0, %v1232_v29 }
 0x214   : > { %v1259_v41 = vperm.slane %v1253_v38, %v2862_v62  ;;  %v1241_v42 = vperm.slane %v1233_v40, %v2853_v46  ;;  %v1264_v44 = vrot.slane %v1251_v36, 4 }
 0x215   : > { %v1109_v47 = vsel %vm1078_vm4, %v1108_v33, %v1095_v37  ;;  %v1255_v48 = vsel %vm1078_vm4, %v1247_v24, %v1254_v39 }
 0x216   : > { %v1113_v49 = vperm.slane %v1109_v47, %v2862_v62  ;;  %2393 = vmatpush.xpose.msk.msra.mxu2 %vm1400_vm5, %v1259_v41  ;;  %v1263_v50 = vperm.slane %v1255_v48, %v2862_v62  ;;  %v1276_v51 = vrot.slane %v1259_v41, 4  ;;  %v1265_v52 = vsel %vm1078_vm4, %v1264_v44, %v1241_v42 }
 0x217   : > { %v1266_v53 = vrot.slane %v1241_v42, 4  ;;  %v1271_v54 = vperm.slane %v1265_v52, %v2862_v62 }
 0x218   : > { %v1114_v55 = vrot.slane %v1113_v49, 4  ;;  %v1277_v56 = vsel %vm1078_vm4, 0.0, %v1276_v51  ;;  %v1278_v57 = vrot.slane %v1263_v50, 4  ;;  %v1117_v58 = vsel %vm1078_vm4, %v1113_v49, %v1116_v45 }
 0x219   : > { %2395 = vmatpush.xpose.msk.msra.mxu3 %vm1400_vm5, %v1277_v56  ;;  %2401 = vmatpush.xpose.msk.msrb.mxu0 %vm1400_vm5, %v1271_v54  ;;  %v1280_v59 = vrot.slane %v1271_v54, 4  ;;  %v1128_v60 = vrot.slane %v1117_v58, 4  ;;  %v1133_v61 = vperm.slane %v1117_v58, %v2853_v46  ;;  %v1267_v63 = vsel %vm1078_vm4, %v1251_v36, %v1266_v53 }
 0x21a   : > { %2397 = vmatpush.xpose.msk.msrb.mxu2 %vm1400_vm5, %v1263_v50  ;;  %v1279_v0 = vsel %vm1078_vm4, 0.0, %v1278_v57  ;;  %v1115_v1 = vsel %vm1078_vm4, %v1114_v55, %v1107_v25  ;;  %v1275_v8 = vperm.slane %v1267_v63, %v2862_v62 }
 0x21b   : > { %v1281_v2 = vsel %vm1078_vm4, 0.0, %v1280_v59  ;;  %v1118_v3 = vrot.slane %v1115_v1, 4  ;;  %v1123_v5 = vperm.slane %v1115_v1, %v2853_v46  ;;  %v1129_v6 = vsel %vm1078_vm4, 0.0, %v1128_v60 }
 0x21c   : > { %2403 = vmatpush.xpose.msk.msrb.mxu1 %vm1400_vm5, %v1281_v2  ;;  %v1138_v7 = vrot.slane %v1133_v61, 4  ;;  %v1137_v9 = vperm.slane %v1129_v6, %v2853_v46  ;;  %v1282_v17 = vrot.slane %v1275_v8, 4 }
 0x21d   : > { %2399 = vmatpush.xpose.msk.msrb.mxu3 %vm1400_vm5, %v1279_v0  ;;  %v1119_v10 = vsel %vm1078_vm4, 0.0, %v1118_v3  ;;  %v1140_v11 = vrot.slane %v1123_v5, 4 }
 0x21e   : > { %v1139_v12 = vsel %vm1078_vm4, %v1138_v7, %v1123_v5  ;;  %v1127_v13 = vperm.slane %v1119_v10, %v2853_v46  ;;  %v1150_v14 = vrot.slane %v1137_v9, 4  ;;  %v1283_v25 = vsel %vm1078_vm4, 0.0, %v1282_v17 }
 0x21f   : > { %v1145_v15 = vperm.slane %v1139_v12, %v2862_v62  ;;  %v1141_v18 = vsel %vm1078_vm4, %v1133_v61, %v1140_v11 }
 0x220   : > { %v1151_v16 = vsel %vm1078_vm4, %v1150_v14, %v1127_v13  ;;  %v1149_v23 = vperm.slane %v1141_v18, %v2862_v62  ;;  %v1152_v24 = vrot.slane %v1127_v13, 4 }
 0x221   : > { %2394 = vmatmul.msk.f32.vlgmr.msra.gmra.mxu2 %vm1400_vm5, %v1145_v15  ;;  %v1162_v19 = vrot.slane %v1145_v15, 4  ;;  %v1157_v20 = vperm.slane %v1151_v16, %v2862_v62 }
 0x222   : > { %2405 = vmatpush.xpose.msk.msra.mxu2 %vm1400_vm5, %v1275_v8  ;;  %v1164_v27 = vrot.slane %v1149_v23, 4  ;;  %v1153_v28 = vsel %vm1078_vm4, %v1137_v9, %v1152_v24 }
 0x223   : > { %v1163_v21 = vsel %vm1078_vm4, 0.0, %v1162_v19  ;;  %2402 = vmatmul.msk.f32.vlgmr.msrb.gmra.mxu0 %vm1400_vm5, %v1157_v20  ;;  %v1166_v22 = vrot.slane %v1157_v20, 4  ;;  %v1161_v30 = vperm.slane %v1153_v28, %v2862_v62 }
 0x224   : > { %2396 = vmatmul.msk.f32.vlgmr.msra.gmra.mxu3 %vm1400_vm5, %v1163_v21  ;;  %v1165_v29 = vsel %vm1078_vm4, 0.0, %v1164_v27 }
 0x225   : > { %2407 = vmatpush.xpose.msk.msra.mxu3 %vm1400_vm5, %v1283_v25  ;;  %v1167_v26 = vsel %vm1078_vm4, 0.0, %v1166_v22  ;;  %v1168_v31 = vrot.slane %v1161_v30, 4 }
 0x226   : > { %2404 = vmatmul.msk.f32.vlgmr.msrb.gmra.mxu1 %vm1400_vm5, %v1167_v26 }
 0x227   : > { %v1169_v32 = vsel %vm1078_vm4, 0.0, %v1168_v31 }
 0x229   : > { %2398 = vmatmul.msk.f32.vlgmr.msrb.gmra.mxu2 %vm1400_vm5, %v1149_v23 }
 0x22c   : > { %2400 = vmatmul.msk.f32.vlgmr.msrb.gmra.mxu3 %vm1400_vm5, %v1165_v29 }
 0x231   : > { %2406 = vmatmul.msk.f32.vlgmr.msra.gmra.mxu2 %vm1400_vm5, %v1161_v30 }
 0x234   : > { %2408 = vmatmul.msk.f32.vlgmr.msra.gmra.mxu3 %vm1400_vm5, %v1169_v32 }
 0x239   : > { %v1295_v53 = vpop.permute.xlu2 %1294 }
 0x262   : > { %v1291_v55 = vpop.permute.xlu1 %1290 }
 0x263   : > { %v1314_v32 = vrot.slane %v1291_v55, 4 }
 0x26a   : > { %v1299_v52 = vpop.permute.xlu0 %1298 }
 0x26b   : > { %v1326_v10 = vrot.slane %v1299_v52, 4 }
 0x26d   : > { %v1327_v18 = vsel %vm1078_vm4, %v1326_v10, %v1295_v53 }
 0x26e   : > { %v1331_v25 = vperm.slane %v1327_v18, %v2853_v46 }
 0x272   : > { %v1297_v54 = vpop.permute.xlu0 %1296 }
 0x273   : > { %v1320_v26 = vrot.slane %v1297_v54, 4 }
 0x27a   : > { %v2960_v58 = vpop.permute.xlu0 %1288 }
 0x2a0   : > { %v2943_v33 = vpop.f32.mrf.mxu0 }
 0x2a1   : > { %v1622_v34 = vsel %vm1609_vm6, %v2943_v33, -inf }
 0x2a2   : > { %1623 = vmax.xlane.f32.xlu2 %v1622_v34 }
 0x2a3   : > { %v1554_v36 = vpop.f32.mrf.mxu1 }
 0x2a4   : > { %v1424_v37 = vpop.f32.mrf.mxu2  ;;  %v1625_v38 = vsel %vm1609_vm6, %v1554_v36, -inf }
 0x2a5   : > { %1626 = vmax.xlane.f32.xlu1 %v1625_v38  ;;  %v1610_v40 = vsel %vm1609_vm6, %v1424_v37, -inf }
 0x2a7   : > { %v1450_v39 = vpop.f32.mrf.mxu3 }
 0x2a8   : > { %v1613_v42 = vsel %vm1609_vm6, %v1450_v39, -inf }
 0x2aa   : > { %1611 = vmax.xlane.f32.xlu2 %v1610_v40 }
 0x2ac   : > { %v1476_v41 = vpop.f32.mrf.mxu2 }
 0x2ad   : > { %v1616_v44 = vsel %vm1609_vm6, %v1476_v41, -inf  ;;  %1614 = vmax.xlane.f32.xlu1 %v1613_v42 }
 0x2ae   : > { %1617 = vmax.xlane.f32.xlu0 %v1616_v44  ;;  %v1308_v44 = vrot.slane %v2960_v58, 4 }
 0x2af   : > { %v1502_v45 = vpop.f32.mrf.mxu3 }
 0x2b0   : > { %v1619_v47 = vsel %vm1609_vm6, %v1502_v45, -inf }
 0x2b2   : > { %1620 = vmax.xlane.f32.xlu2 %v1619_v47 }
 0x2b4   : > { %v1580_v48 = vpop.f32.mrf.mxu2 }
 0x2b5   : > { %v1628_v49 = vsel %vm1609_vm6, %v1580_v48, -inf }
 0x2b6   : > { %1629 = vmax.xlane.f32.xlu0 %v1628_v49 }
 0x2b7   : > { %v1606_v50 = vpop.f32.mrf.mxu3 }
 0x2b8   : > { %v1631_v51 = vsel %vm1609_vm6, %v1606_v50, -inf }
 0x2ba   : > { %1632 = vmax.xlane.f32.xlu2 %v1631_v51 }
 0x2c6   : > { %1286 = vrot.lane.b32.xlu1 %v2848_v43, %s2614_s23 }
 0x2ca   : > { %1284 = vrot.lane.b32.xlu0 %v2830_v35, %s2614_s23 }
 0x2d2   : > { %1292 = vrot.lane.b32.xlu2 %v2867_v4, %s2614_s23 }
 0x315   : > { %v1624_v56 = vpop.xlane.xlu2 %1623 }
 0x316   : > { %v1638_v11 = vsub.f32 %v2943_v33, %v1624_v56 }
 0x318   : > { %v1627_v57 = vpop.xlane.xlu1 %1626  ;;  %v1650_v19 = vmul.f32 1.442695, %v1638_v11 }
 0x319   : > { %v1639_v43 = vsub.f32 %v1554_v36, %v1627_v57  ;;  %v1338_v36 = vrot.slane %v1331_v25, 4 }
 0x31b   : > { %v1652_v5 = vmul.f32 1.442695, %v1639_v43 }
 0x31d   : > { %v1612_v59 = vpop.xlane.xlu2 %1611 }
 0x31e   : > { %v1634_v2 = vsub.f32 %v1424_v37, %v1612_v59 }
 0x320   : > { %v1615_v60 = vpop.xlane.xlu1 %1614  ;;  %v1642_v6 = vmul.f32 1.442695, %v1634_v2 }
 0x321   : > { %v1618_v61 = vpop.xlane.xlu0 %1617  ;;  %v1635_v63 = vsub.f32 %v1450_v39, %v1615_v60 }
 0x322   : > { %v1636_v0 = vsub.f32 %v1476_v41, %v1618_v61 }
 0x323   : > { %v1644_v1 = vmul.f32 1.442695, %v1635_v63 }
 0x324   : > { %v1646_v35 = vmul.f32 1.442695, %v1636_v0 }
 0x325   : > { %2517 = vpow2.f32 %v1644_v1  ;;  %v1621_v3 = vpop.xlane.xlu2 %1620 }
 0x326   : > { %2519 = vpow2.f32 %v1646_v35  ;;  %v1637_v4 = vsub.f32 %v1502_v45, %v1621_v3 }
 0x328   : > { %v1648_v7 = vmul.f32 1.442695, %v1637_v4 }
 0x329   : > { %v1630_v13 = vpop.xlane.xlu0 %1629 }
 0x32a   : > { %2521 = vpow2.f32 %v1648_v7  ;;  %v1640_v20 = vsub.f32 %v1580_v48, %v1630_v13 }
 0x32b   : > { %v2962_v8 = vpop.eup %2517  ;;  %2523 = vpow2.f32 %v1652_v5 }
 0x32c   : > { %v2964_v9 = vpop.eup %2519  ;;  %2525 = vpow2.f32 %v1642_v6  ;;  %v1661_v12 = vsel %vm1609_vm6, %v2962_v8, 0.0  ;;  %v1654_v27 = vmul.f32 1.442695, %v1640_v20 }
 0x32d   : > { %v1664_v14 = vsel %vm1609_vm6, %v2964_v9, 0.0  ;;  %1662 = vadd.xlane.f32.xlu0 %v1661_v12  ;;  %v1633_v15 = vpop.xlane.xlu2 %1632 }
 0x32e   : > { %1665 = vadd.xlane.f32.xlu2 %v1664_v14  ;;  %v1641_v16 = vsub.f32 %v1606_v50, %v1633_v15 }
 0x330   : > { %v2971_v17 = vpop.eup %2521  ;;  %v1656_v21 = vmul.f32 1.442695, %v1641_v16 }
 0x331   : > { %v2974_v22 = vpop.eup %2523  ;;  %v1667_v23 = vsel %vm1609_vm6, %v2971_v17, 0.0 }
 0x332   : > { %v2978_v24 = vpop.eup %2525  ;;  %2527 = vpow2.f32 %v1656_v21  ;;  %1668 = vadd.xlane.f32.xlu1 %v1667_v23  ;;  %v1673_v28 = vsel %vm1609_vm6, %v2974_v22, 0.0 }
 0x333   : > { %2529 = vpow2.f32 %v1650_v19  ;;  %v1658_v29 = vsel %vm1609_vm6, %v2978_v24, 0.0 }
 0x334   : > { %2531 = vpow2.f32 %v1654_v27 }
 0x335   : > { %1674 = vadd.xlane.f32.xlu0 %v1673_v28  ;;  %v1293_v30 = vpop.permute.xlu2 %1292 }
 0x336   : > { %1659 = vadd.xlane.f32.xlu2 %v1658_v29  ;;  %v1321_v31 = vsel %vm1078_vm4, %v1320_v26, %v1293_v30 }
 0x337   : > { %v1325_v33 = vperm.slane %v1321_v31, %v2853_v46 }
 0x338   : > { %v2987_v34 = vpop.eup %2527  ;;  %v1287_v37 = vpop.permute.xlu1 %1286 }
 0x339   : > { %v1315_v38 = vsel %vm1078_vm4, %v1314_v32, %v1287_v37  ;;  %v1679_v39 = vsel %vm1609_vm6, %v2987_v34, 0.0  ;;  %v2992_v40 = vpop.eup %2529  ;;  %v1339_v41 = vsel %vm1078_vm4, %v1338_v36, %v1325_v33 }
 0x33a   : > { %v1319_v42 = vperm.slane %v1315_v38, %v2853_v46  ;;  %1680 = vadd.xlane.f32.xlu1 %v1679_v39  ;;  %v1343_v48 = vperm.slane %v1339_v41, %v2862_v62  ;;  %v1670_v50 = vsel %vm1609_vm6, %v2992_v40, 0.0  ;;  %v3001_v51 = vpop.eup %2531 }
 0x33b   : > { %v1676_v56 = vsel %vm1609_vm6, %v3001_v51, 0.0 }
 0x33c   : > { %v1332_v45 = vrot.slane %v1319_v42, 4  ;;  %v1285_v47 = vpop.permute.xlu0 %1284  ;;  %v1344_v54 = vrot.slane %v1343_v48, 4 }
 0x33d   : > { %v1309_v49 = vsel %vm1078_vm4, %v1308_v44, %v1285_v47 }
 0x33e   : > { %v1313_v52 = vperm.slane %v1309_v49, %v2853_v46  ;;  %1671 = vadd.xlane.f32.xlu2 %v1670_v50 }
 0x340   : > { %v1333_v53 = vsel %vm1078_vm4, %v1332_v45, %v1313_v52 }
 0x341   : > { %v1337_v55 = vperm.slane %v1333_v53, %v2862_v62 }
 0x342   : > { %1677 = vadd.xlane.f32.xlu1 %v1676_v56 }
 0x343   : > { %v1345_v57 = vsel %vm1078_vm4, %v1344_v54, %v1337_v55  ;;  %v1346_v58 = vrot.slane %v1337_v55, 4 }
 0x344   : > { %v1348_v59 = vrot.slane %v1345_v57, 4  ;;  %v1353_v60 = vperm.slane %v1345_v57, %v2853_v46 }
 0x345   : > { %v1347_v61 = vsel %vm1078_vm4, %v1343_v48, %v1346_v58 }
 0x346   : > { %v1349_v63 = vsel %vm1078_vm4, 0.0, %v1348_v59  ;;  %v1358_v0 = vrot.slane %v1347_v61, 4  ;;  %v1363_v43 = vperm.slane %v1347_v61, %v2853_v46  ;;  %v1370_v1 = vrot.slane %v1353_v60, 4 }
 0x347   : > { %v1357_v2 = vperm.slane %v1349_v63, %v2853_v46 }
 0x348   : > { %v1359_v35 = vsel %vm1078_vm4, 0.0, %v1358_v0  ;;  %v1371_v3 = vsel %vm1078_vm4, %v1363_v43, %v1370_v1  ;;  %v1368_v4 = vrot.slane %v1363_v43, 4 }
 0x349   : > { %v1379_v5 = vperm.slane %v1371_v3, %v2862_v62  ;;  %v1367_v6 = vperm.slane %v1359_v35, %v2853_v46  ;;  %v1382_v7 = vrot.slane %v1357_v2, 4 }
 0x34a   : > { %v1369_v10 = vsel %vm1078_vm4, %v1368_v4, %v1353_v60 }
 0x34b   : > { %2413 = vmatpush.msk.msrb.mxu2 %vm1806_vm7, %v1379_v5  ;;  %v1375_v11 = vperm.slane %v1369_v10, %v2862_v62  ;;  %v1394_v12 = vrot.slane %v1379_v5, 4  ;;  %v1383_v13 = vsel %vm1078_vm4, %v1367_v6, %v1382_v7  ;;  %v1380_v14 = vrot.slane %v1367_v6, 4 }
 0x34c   : > { %v1391_v15 = vperm.slane %v1383_v13, %v2862_v62 }
 0x34d   : > { %2409 = vmatpush.msk.msra.mxu0 %vm1806_vm7, %v1375_v11  ;;  %v1395_v16 = vsel %vm1078_vm4, 0.0, %v1394_v12  ;;  %v1392_v18 = vrot.slane %v1375_v11, 4  ;;  %v1381_v19 = vsel %vm1078_vm4, %v1380_v14, %v1357_v2 }
 0x34e   : > { %2415 = vmatpush.msk.msrb.mxu3 %vm1806_vm7, %v1395_v16  ;;  %2421 = vmatpush.msk.msra.mxu2 %vm1806_vm7, %v1391_v15  ;;  %v1387_v20 = vperm.slane %v1381_v19, %v2862_v62  ;;  %v1398_v21 = vrot.slane %v1391_v15, 4 }
 0x34f   : > { %v1393_v23 = vsel %vm1078_vm4, 0.0, %v1392_v18 }
 0x350   : > { %2411 = vmatpush.msk.msra.mxu1 %vm1806_vm7, %v1393_v23  ;;  %2417 = vmatpush.msk.msrb.mxu0 %vm1806_vm7, %v1387_v20  ;;  %v1399_v25 = vsel %vm1078_vm4, 0.0, %v1398_v21  ;;  %v1396_v26 = vrot.slane %v1387_v20, 4 }
 0x351   : > { %2423 = vmatpush.msk.msra.mxu3 %vm1806_vm7, %v1399_v25 }
 0x352   : > { %v1397_v27 = vsel %vm1078_vm4, 0.0, %v1396_v26 }
 0x353   : > { %2419 = vmatpush.msk.msrb.mxu1 %vm1806_vm7, %v1397_v27 }
 0x3a0   : > { %v1663_v28 = vpop.xlane.xlu0 %1662 }
 0x3a1   : > { %2533 = vrcp.f32 %v1663_v28  ;;  %v1666_v29 = vpop.xlane.xlu2 %1665  ;;  %v1706_v36 = vand.u32 2147483647, %v1663_v28  ;;  %v1708_v37 = vand.u32 2147483648, %v1663_v28  ;;  %vm1702_vm8 = vweird.f32 %v1663_v28 }
 0x3a2   : > { %2535 = vrcp.f32 %v1666_v29  ;;  %v1721_v41 = vand.u32 2147483647, %v1666_v29  ;;  %v1723_v45 = vand.u32 2147483648, %v1666_v29  ;;  %vm1717_vm9 = vweird.f32 %v1666_v29 }
 0x3a3   : > { %vm3049_vm11 = vcmp.eq.f32.partialorder %v1706_v36, 8.507059e+37  ;;  %v1709_v54 = vor.u32 1.1754944e-38, %v1708_v37 }
 0x3a4   : > { %vm3053_vm13 = vcmp.eq.f32.partialorder %v1721_v41, 8.507059e+37  ;;  %v1724_v60 = vor.u32 1.1754944e-38, %v1723_v45 }
 0x3a5   : > { %v3036_v30 = vpop.xlane.xlu1 %1668 }
 0x3a6   : > { %2537 = vrcp.f32 %v3036_v30  ;;  %v1736_v48 = vand.u32 2147483647, %v3036_v30  ;;  %v1738_v49 = vand.u32 2147483648, %v3036_v30  ;;  %vm1732_vm14 = vweird.f32 %v3036_v30 }
 0x3a7   : > { %v2534_v31 = vpop.eup %2533 }
 0x3a8   : > { %v2536_v32 = vpop.eup %2535  ;;  %v1698_v33 = vmul.f32 %v2534_v31, %v1663_v28  ;;  %v3039_v38 = vpop.xlane.xlu0 %1674  ;;  %vm1703_vm10 = vweird.f32 %v2534_v31  ;;  %vm3068_vm1 = vcmp.eq.f32.partialorder %v1736_v48, 8.507059e+37  ;;  %v1739_v2 = vor.u32 1.1754944e-38, %v1738_v49 }
 0x3a9   : > { %v1713_v39 = vmul.f32 %v2536_v32, %v1666_v29  ;;  %2539 = vrcp.f32 %v3039_v38  ;;  %v3042_v42 = vpop.xlane.xlu2 %1659  ;;  %vm1718_vm12 = vweird.f32 %v2536_v32  ;;  %vm3064_vm0 = vmor %vm1702_vm8, %vm1703_vm10  ;;  %v1766_v35 = vand.u32 2147483647, %v3039_v38 }
 0x3aa   : > { %v1699_v44 = vsub.f32 1.0, %v1698_v33  ;;  %2541 = vrcp.f32 %v3042_v42  ;;  %vm3075_vm2 = vmor %vm1717_vm9, %vm1718_vm12  ;;  %vm1762_vm7 = vweird.f32 %v3039_v38  ;;  %v1768_v6 = vand.u32 2147483648, %v3039_v38 }
 0x3ab   : > { %v1714_v47 = vsub.f32 1.0, %v1713_v39  ;;  %vm1687_vm8 = vweird.f32 %v3042_v42  ;;  %v1691_v15 = vand.u32 2147483647, %v3042_v42  ;;  %v1693_v16 = vand.u32 2147483648, %v3042_v42 }
 0x3ac   : > { %v3047_v50 = vpop.eup %2537  ;;  %v1700_v52 = vmul.f32 %v2534_v31, %v1699_v44  ;;  %vm3095_vm9 = vcmp.eq.f32.partialorder %v1766_v35, 8.507059e+37  ;;  %v1769_v36 = vor.u32 1.1754944e-38, %v1768_v6 }
 0x3ad   : > { %v1715_v55 = vmul.f32 %v2536_v32, %v1714_v47  ;;  %v1728_v57 = vmul.f32 %v3047_v50, %v3036_v30  ;;  %v3059_v58 = vpop.xlane.xlu1 %1680  ;;  %vm1733_vm6 = vweird.f32 %v3047_v50  ;;  %v1694_v37 = vor.u32 1.1754944e-38, %v1693_v16 }
 0x3ae   : > { %v1701_v59 = vadd.f32 %v2534_v31, %v1700_v52  ;;  %2543 = vrcp.f32 %v3059_v58  ;;  %vm3108_vm10 = vmor %vm1732_vm14, %vm1733_vm6 }
 0x3af   : > { %v2540_v61 = vpop.eup %2539  ;;  %v1716_v0 = vadd.f32 %v2536_v32, %v1715_v55  ;;  %v1729_v43 = vsub.f32 1.0, %v1728_v57 }
 0x3b0   : > { %v2542_v3 = vpop.eup %2541  ;;  %v1758_v5 = vmul.f32 %v2540_v61, %v3039_v38  ;;  %v1705_v7 = vsel %vm3064_vm0, %v2534_v31, %v1701_v59  ;;  %vm1763_vm12 = vweird.f32 %v2540_v61  ;;  %v1798_v38 = vand.u32 2147483648, %v3059_v58 }
 0x3b1   : > { %v1720_v10 = vsel %vm3075_vm2, %v2536_v32, %v1716_v0  ;;  %v1730_v11 = vmul.f32 %v3047_v50, %v1729_v43  ;;  %v1683_v12 = vmul.f32 %v2542_v3, %v3042_v42  ;;  %v3089_v13 = vpop.xlane.xlu2 %1671  ;;  %v1710_v23 = vsel %vm3049_vm11, %v1709_v54, %v1705_v7 }
 0x3b2   : > { %v1759_v14 = vsub.f32 1.0, %v1758_v5  ;;  %2545 = vrcp.f32 %v3089_v13  ;;  %v1725_v25 = vsel %vm3053_vm13, %v1724_v60, %v1720_v10  ;;  %vm1688_vm0 = vweird.f32 %v2542_v3  ;;  %vm3124_vm13 = vmor %vm1762_vm7, %vm1763_vm12 }
 0x3b3   : > { %v1731_v18 = vadd.f32 %v3047_v50, %v1730_v11  ;;  %v1684_v20 = vsub.f32 1.0, %v1683_v12  ;;  %vm3118_vm11 = vcmp.eq.f32.partialorder %v1691_v15, 8.507059e+37  ;;  %v1711_v45 = vmul.f32 %v2962_v8, %v1710_v23  ;;  %vm1689_vm14 = vmor %vm1687_vm8, %vm1688_vm0 }
 0x3b4   : > { %v2544_v21 = vpop.eup %2543  ;;  %v1760_v27 = vmul.f32 %v2540_v61, %v1759_v14  ;;  %v1726_v47 = vmul.f32 %v2964_v9, %v1725_v25  ;;  %v1796_v8 = vand.u32 2147483647, %v3059_v58  ;;  %v1799_v59 = vor.u32 1.1754944e-38, %v1798_v38 }
 0x3b5   : > { %v1735_v28 = vsel %vm3108_vm10, %v3047_v50, %v1731_v18  ;;  %v1685_v29 = vmul.f32 %v2542_v3, %v1684_v20  ;;  %v1788_v31 = vmul.f32 %v2544_v21, %v3059_v58  ;;  %v3116_v32 = vpop.xlane.xlu1 %1677  ;;  %vm1793_vm2 = vweird.f32 %v2544_v21  ;;  %2412 = vmatmul.msk.f32.vlgmr.msra.gmra.mxu1 %vm1802_vm15, %v1711_v45 }
 0x3b6   : > { %v1761_v33 = vadd.f32 %v2540_v61, %v1760_v27  ;;  %v1740_v48 = vsel %vm3068_vm1, %v1739_v2, %v1735_v28  ;;  %2547 = vrcp.f32 %v3116_v32  ;;  %2414 = vmatmul.msk.f32.vlgmr.msrb.gmra.mxu2 %vm1802_vm15, %v1726_v47  ;;  %vm1792_vm1 = vweird.f32 %v3059_v58 }
 0x3b7   : > { %v1686_v41 = vadd.f32 %v2542_v3, %v1685_v29  ;;  %v1789_v44 = vsub.f32 1.0, %v1788_v31  ;;  %v1741_v56 = vmul.f32 %v2971_v17, %v1740_v48  ;;  %vm1794_vm6 = vmor %vm1792_vm1, %vm1793_vm2  ;;  %vm1797_vm7 = vcmp.eq.f32.partialorder %v1796_v8, 8.507059e+37 }
 0x3b8   : > { %v1765_v49 = vsel %vm3124_vm13, %v2540_v61, %v1761_v33  ;;  %v2546_v50 = vpop.eup %2545  ;;  %v1753_v63 = vand.u32 2147483648, %v3089_v13  ;;  %v1751_v17 = vand.u32 2147483647, %v3089_v13  ;;  %v1781_v10 = vand.u32 2147483647, %v3116_v32 }
 0x3b9   : > { %v1690_v52 = vsel %vm1689_vm14, %v2542_v3, %v1686_v41  ;;  %v1790_v53 = vmul.f32 %v2544_v21, %v1789_v44  ;;  %v1770_v9 = vsel %vm3095_vm9, %v1769_v36, %v1765_v49  ;;  %v1743_v54 = vmul.f32 %v2546_v50, %v3089_v13  ;;  %2416 = vmatmul.msk.f32.vlgmr.msrb.gmra.mxu3 %vm1802_vm15, %v1741_v56 }
 0x3ba   : > { %v1695_v42 = vsel %vm3118_vm11, %v1694_v37, %v1690_v52  ;;  %v1771_v0 = vmul.f32 %v2974_v22, %v1770_v9  ;;  %vm1748_vm8 = vweird.f32 %v2546_v50  ;;  %vm1747_vm9 = vweird.f32 %v3089_v13 }
 0x3bb   : > { %v1791_v55 = vadd.f32 %v2544_v21, %v1790_v53  ;;  %v1696_v57 = vmul.f32 %v2978_v24, %v1695_v42  ;;  %v1744_v60 = vsub.f32 1.0, %v1743_v54  ;;  %vm1749_vm10 = vmor %vm1747_vm9, %vm1748_vm8  ;;  %v1754_v35 = vor.u32 1.1754944e-38, %v1753_v63 }
 0x3bc   : > { %v2548_v43 = vpop.eup %2547  ;;  %vm1752_vm12 = vcmp.eq.f32.partialorder %v1751_v17, 8.507059e+37  ;;  %v1783_v22 = vand.u32 2147483648, %v3116_v32  ;;  %vm1777_vm11 = vweird.f32 %v3116_v32  ;;  %vm1782_vm14 = vcmp.eq.f32.partialorder %v1781_v10, 8.507059e+37 }
 0x3bd   : > { %v1795_v61 = vsel %vm1794_vm6, %v2544_v21, %v1791_v55  ;;  %2410 = vmatmul.msk.f32.vlgmr.msra.gmra.mxu0 %vm1802_vm15, %v1696_v57  ;;  %v1745_v58 = vmul.f32 %v2546_v50, %v1744_v60  ;;  %v1773_v24 = vmul.f32 %v2548_v43, %v3116_v32  ;;  %2420 = vmatmul.msk.f32.vlgmr.msrb.gmra.mxu1 %vm1802_vm15, %v1771_v0  ;;  %vm1778_vm0 = vweird.f32 %v2548_v43 }
 0x3be   : > { %v1800_v1 = vsel %vm1797_vm7, %v1799_v59, %v1795_v61  ;;  %vm1779_vm13 = vmor %vm1777_vm11, %vm1778_vm0  ;;  %v1784_v13 = vor.u32 1.1754944e-38, %v1783_v22  ;;  %vm2137_vm2 = vcmask 130048   ;;  %vm2139_vm1 = vcmask 162816  }
 0x3bf   : > { %v1746_v2 = vadd.f32 %v2546_v50, %v1745_v58  ;;  %v1774_v3 = vsub.f32 1.0, %v1773_v24  ;;  %v1801_v4 = vmul.f32 %v2987_v34, %v1800_v1  ;;  %vm2141_vm6 = vcmask 195584  }
 0x3c0   : > { %vm2143_vm7 = vcmask 228352  }
 0x3c1   : > { %v1750_v5 = vsel %vm1749_vm10, %v2546_v50, %v1746_v2  ;;  %v1775_v7 = vmul.f32 %v2548_v43, %v1774_v3  ;;  %2424 = vmatmul.msk.f32.vlgmr.msra.gmra.mxu3 %vm1802_vm15, %v1801_v4 }
 0x3c2   : > { %v1755_v6 = vsel %vm1752_vm12, %v1754_v35, %v1750_v5 }
 0x3c3   : > { %v1756_v11 = vmul.f32 %v2992_v40, %v1755_v6  ;;  %v1776_v12 = vadd.f32 %v2548_v43, %v1775_v7 }
 0x3c5   : > { %2418 = vmatmul.msk.f32.vlgmr.msrb.gmra.mxu0 %vm1802_vm15, %v1756_v11  ;;  %v1780_v34 = vsel %vm1779_vm13, %v2548_v43, %v1776_v12  ;;  %v2148_v12 = vld [vmem:[%s3235_s6 + $0x18] sm:$0xff] }
 0x3c6   : > { %v1785_v14 = vsel %vm1782_vm14, %v1784_v13, %v1780_v34  ;;  %2168 = vmatpush.msra.mxu0 %v2148_v12  ;;  %v2146_v13 = vld [vmem:[%s3235_s6 + $0x8] sm:$0xff]  ;;  %v2145_v34 = vld [vmem:[%s3235_s6] sm:$0xff] }
 0x3c7   : > { %v1786_v15 = vmul.f32 %v3001_v51, %v1785_v14 }
 0x3c9   : > { %2422 = vmatmul.msk.f32.vlgmr.msra.gmra.mxu2 %vm1802_vm15, %v1786_v15  ;;  %vm2135_vm15 = vcmask 97280  }
 0x432   : > { %v1853_v16 = vpop.f32.mrf.mxu1 }
 0x439   : > { %v1879_v40 = vpop.f32.mrf.mxu2 }
 0x43a   : > { %v2012_v21 = vrot.slane %v1879_v40, 4  ;;  %v1827_v23 = vpop.f32.mrf.mxu0  ;;  %v1957_v29 = vpop.f32.mrf.mxu1 }
 0x43c   : > { %v1905_v18 = vpop.f32.mrf.mxu3  ;;  %v2013_v27 = vsel %vm1078_vm4, %v2012_v21, %v1827_v23 }
 0x43d   : > { %v2018_v19 = vrot.slane %v1905_v18, 4  ;;  %v2017_v32 = vperm.slane %v2013_v27, %v2853_v46 }
 0x43f   : > { %v2019_v20 = vsel %vm1078_vm4, %v2018_v19, %v1853_v16 }
 0x440   : > { %v2023_v25 = vperm.slane %v2019_v20, %v2853_v46 }
 0x442   : > { %v2036_v31 = vrot.slane %v2023_v25, 4  ;;  %v1931_v39 = vpop.f32.mrf.mxu0 }
 0x444   : > { %v2009_v26 = vpop.f32.mrf.mxu3  ;;  %v2037_v33 = vsel %vm1078_vm4, %v2036_v31, %v2017_v32  ;;  %v2516_v31 = vld [vmem:[%s3236_s7] ss:$0 sm:$0xff] }
 0x445   : > { %v2030_v28 = vrot.slane %v2009_v26, 4  ;;  %v2041_v41 = vperm.slane %v2037_v33, %v2862_v62 }
 0x447   : > { %v2031_v51 = vsel %vm1078_vm4, %v2030_v28, %v1957_v29  ;;  %v2050_v49 = vrot.slane %v2041_v41, 4 }
 0x448   : > { %v2035_v36 = vperm.slane %v2031_v51, %v2853_v46 }
 0x44a   : > { %v2042_v45 = vrot.slane %v2035_v36, 4 }
 0x44c   : > { %v1983_v30 = vpop.f32.mrf.mxu2 }
 0x44d   : > { %v2024_v37 = vrot.slane %v1983_v30, 4 }
 0x44f   : > { %v2025_v44 = vsel %vm1078_vm4, %v2024_v37, %v1931_v39 }
 0x450   : > { %v2029_v47 = vperm.slane %v2025_v44, %v2853_v46 }
 0x452   : > { %v2043_v48 = vsel %vm1078_vm4, %v2042_v45, %v2029_v47 }
 0x453   : > { %v2047_v38 = vperm.slane %v2043_v48, %v2862_v62 }
 0x455   : > { %v2048_v50 = vrot.slane %v2047_v38, 4  ;;  %v2051_v52 = vsel %vm1078_vm4, %v2047_v38, %v2050_v49 }
 0x456   : > { %v2062_v53 = vrot.slane %v2051_v52, 4  ;;  %v2067_v8 = vperm.slane %v2051_v52, %v2853_v46 }
 0x457   : > { %v2049_v9 = vsel %vm1078_vm4, %v2048_v50, %v2041_v41 }
 0x458   : > { %v2057_v42 = vperm.slane %v2049_v9, %v2853_v46  ;;  %v2072_v54 = vrot.slane %v2067_v8, 4  ;;  %v2052_v55 = vrot.slane %v2049_v9, 4  ;;  %v2063_v56 = vsel %vm1078_vm4, 0.0, %v2062_v53 }
 0x459   : > { %v2071_v57 = vperm.slane %v2063_v56, %v2853_v46 }
 0x45a   : > { %v2074_v59 = vrot.slane %v2057_v42, 4  ;;  %v2073_v60 = vsel %vm1078_vm4, %v2072_v54, %v2057_v42  ;;  %v2053_v61 = vsel %vm1078_vm4, 0.0, %v2052_v55 }
 0x45b   : > { %v2079_v63 = vperm.slane %v2073_v60, %v2862_v62  ;;  %v2061_v0 = vperm.slane %v2053_v61, %v2853_v46  ;;  %v2084_v43 = vrot.slane %v2071_v57, 4 }
 0x45c   : > { %v2075_v1 = vsel %vm1078_vm4, %v2067_v8, %v2074_v59 }
 0x45d   : > { %v2083_v58 = vperm.slane %v2075_v1, %v2862_v62  ;;  %v2096_v17 = vrot.slane %v2079_v63, 4  ;;  %v2085_v24 = vsel %vm1078_vm4, %v2084_v43, %v2061_v0  ;;  %v2086_v4 = vrot.slane %v2061_v0, 4 }
 0x45e   : > { %v2091_v3 = vperm.slane %v2085_v24, %v2862_v62 }
 0x45f   : > { %2109 = vrot.lane.b32.xlu0 %v2083_v58, %s2617_s24  ;;  %v2097_v2 = vsel %vm1078_vm4, 0.0, %v2096_v17  ;;  %v2098_v35 = vrot.slane %v2083_v58, 4  ;;  %v2087_v22 = vsel %vm1078_vm4, %v2071_v57, %v2086_v4 }
 0x460   : > { %2105 = vrot.lane.b32.xlu1 %v2097_v2, %s2618_s25  ;;  %v2100_v5 = vrot.slane %v2091_v3, 4  ;;  %v2095_v6 = vperm.slane %v2087_v22, %v2862_v62  ;;  %v2147_v62 = vld [vmem:[%s3235_s6 + $0x10] sm:$0xff] }
 0x461   : > { %v2099_v46 = vsel %vm1078_vm4, 0.0, %v2098_v35  ;;  %2169 = vmatpush.msra.mxu0 %v2147_v62 }
 0x462   : > { %2113 = vrot.lane.b32.xlu2 %v2099_v46, %s2619_s26  ;;  %v2101_v7 = vsel %vm1078_vm4, 0.0, %v2100_v5  ;;  %v2102_v10 = vrot.slane %v2095_v6, 4 }
 0x463   : > { %2170 = vmatpush.msra.mxu0 %v2146_v13 }
 0x464   : > { %v2103_v11 = vsel %vm1078_vm4, 0.0, %v2102_v10  ;;  %vm2133_vm4 = vcmask 64512  }
 0x465   : > { %2171 = vmatpush.msra.mxu0 %v2145_v34 }
 0x467   : > { %2117 = vrot.lane.b32.xlu0 %v2091_v3, %s2620_s10 }
 0x468   : > { %2121 = vrot.lane.b32.xlu1 %v2101_v7, %s2621_s11 }
 0x46a   : > { %2125 = vrot.lane.b32.xlu2 %v2095_v6, %s2622_s13 }
 0x46f   : > { %2129 = vrot.lane.b32.xlu0 %v2103_v11, %s2623_s14 }
 0x4bc   : > { %v2114_v18 = vpop.permute.xlu2 %2113 }
 0x4c4   : > { %v2126_v26 = vpop.permute.xlu2 %2125 }
 0x4d1   : > { %v2110_v14 = vpop.permute.xlu0 %2109 }
 0x4d2   : > { %v2106_v15 = vpop.permute.xlu1 %2105 }
 0x4d3   : > { %v2132_v16 = vsel %vm1400_vm5, %v2079_v63, %v2106_v15 }
 0x4d4   : > { %v2134_v19 = vsel %vm2133_vm4, %v2132_v16, %v2110_v14 }
 0x4d5   : > { %v2136_v20 = vsel %vm2135_vm15, %v2134_v19, %v2114_v18 }
 0x4d9   : > { %v2118_v40 = vpop.permute.xlu0 %2117 }
 0x4da   : > { %v2138_v21 = vsel %vm2137_vm2, %v2136_v20, %v2118_v40  ;;  %v2122_v23 = vpop.permute.xlu1 %2121 }
 0x4db   : > { %v2140_v25 = vsel %vm2139_vm1, %v2138_v21, %v2122_v23 }
 0x4dc   : > { %v2142_v28 = vsel %vm2141_vm6, %v2140_v25, %v2126_v26 }
 0x4e1   : > { %v2130_v27 = vpop.permute.xlu0 %2129 }
 0x4e2   : > { %v2144_v29 = vsel %vm2143_vm7, %v2142_v28, %v2130_v27 }
 0x4e3   : > { %2425 = vmatmul.msk.f32.vlgmr.msra.gmra.mxu0 %vm1000_vm3, %v2144_v29 }
 0x560   : > { %v2173_v51 = vpop.f32.mrf.mxu0 }
 0x561   : > { %v2174_v32 = vadd.f32 %v2516_v31, %v2173_v51 }
 0x563   : > { %2176 = vst [vmem:[#allocation6] sm:$0x3] %v2174_v32 }
 0x564 PF: > { %p2468_p10 = scmp.eq.s32.totalorder %s2686_s30, 1  ;;  %s2624_s23 = smov [#allocation6]  }
 0x565   : > { %s2183_s24 = sshll.u32 %s2624_s23, 4  ;;  %s2185_s10 = sshll.u32 %s3237_s8, 4  ;;  %s2184_s24 = int_to_ptr.vmem [resolvable:$true] %s2183_s24  ;;  %s2186_s10 = int_to_ptr.hbm [resolvable:$true] %s2185_s10 }
 0x566   : > { %2465 = dma.vmem_to_hbm [thread:$0]  (%p2468_p10), %s2184_s24, 32, %s2186_s10, [#allocation7]  }
 0x567   : > { %2590 = dma.done.wait (%p2468_p10), [#allocation7], 32  }
 0x568   : > { %2592 = vsyncadd (%p2468_p10), [#allocation7], 4294967264 }
 0x569 PF: > { %p16_p11 = scmp.ge.s32.totalorder %s2689_s9, 4   ;;  %s3257_s27 = smov %s2599_s28 }
 0x56a   : > { %s3258_s28 = smov %s2698_s12  ;;  %s3259_s29 = smov %s2689_s9 }
 0x56b   :  { %18 = sbr.rel (!%p16_p11) target bundleno = 2 (0x2), region = 182 }
 0x570   :  { %2199 = vsyncpa [#allocation7], 1 }
 0x571   :  { %2201 = vsyncpa [#allocation7 + $0x1], 1 }

</bundles_post_ra>
